<compile_context>
chip_gen: v7x
topology: tpu7x:2x2x1
jax: 0.10.0
libtpu: 0.0.40
codegen_flags: <defaults>
</compile_context>

<pallas_src>
import jax
import jax.numpy as jnp
from jax.experimental import pallas as pl
from jax.experimental.pallas import tpu as pltpu

_WPAD = 8   # left/right halo width; 8 keeps the interior (sublane-dim) store aligned
_HPAD = 1   # top/bottom halo; H is not a tiled dim so 1 row suffices


def _round_up(x, m):
    return ((x + m - 1) // m) * m


# ----------------------------- fused Pallas kernel ------------------------------

def down_block_kernel(x_ref, w1_ref, s1_ref, w2_ref, wd_ref, s2_ref,
                      o_ref, pool_scr, h1_scr):
    # x_ref : (1, Hh, 2, Wh, 2*Cin) f32   input image, 2x2-pool-friendly (free) layout
    # w1_ref: (9, Cin, Cp)  bf16          conv1 taps, BN1 scale folded, Cout padded to Cp
    # s1_ref: (1, Cp)       f32           conv1 bias + BN1 shift (padded entries are 0)
    # w2_ref: (9, Cp, Cp)   bf16          conv2 taps, BN2 scale folded
    # wd_ref: (Cin, Cp)     bf16          1x1 skip conv, BNd scale folded
    # s2_ref: (1, Cp)       f32           combined conv2+skip shift
    # o_ref : (1, HW, Cp)   f32           lane-dense output (padding sliced off outside)
    # pool_scr: VMEM (Hh+2, Wh+16, Cin) f32   zero ring => SAME padding for conv1
    # h1_scr  : VMEM (Hh+2, Wh+16, Cp)  f32   zero ring => SAME padding for conv2
    _, Hh, _, Wh, two_cin = x_ref.shape
    cin = two_cin // 2
    hw, cp = o_ref.shape[1], o_ref.shape[2]
    f32 = jnp.float32
    PH, PW = _HPAD, _WPAD

    # ---- fused 2x2 max-pool (H pair lives on axis 2, W pair is interleaved in lanes) ----
    a = x_ref[0, :, 0]                                     # (Hh, Wh, 2*cin)
    b = x_ref[0, :, 1]
    hmax = jnp.maximum(a, b)                               # pool over the H pair
    pooled = jnp.maximum(hmax[:, :, :cin], hmax[:, :, cin:])   # pool over the W pair

    # ---- in-kernel im2col support: zero-ringed pooled image in VMEM scratch ----
    pool_scr[...] = jnp.zeros_like(pool_scr)               # halo must be zero every step
    pool_scr[PH:PH + Hh, PW:PW + Wh, :] = pooled           # single aligned interior store

    # ---- conv1 (3x3 SAME) + BN1 + ReLU : 9 shifted reads -> 9 accumulated MXU dots ----
    acc1 = jnp.zeros((hw, cp), f32)
    for k in range(9):
        dy, dx = k // 3, k % 3
        slab = pool_scr[PH - 1 + dy:PH - 1 + dy + Hh,
                        PW - 1 + dx:PW - 1 + dx + Wh, :]
        acc1 = acc1 + jnp.dot(slab.reshape(hw, cin).astype(jnp.bfloat16),
                              w1_ref[k], preferred_element_type=f32)
    h1 = jnp.maximum(acc1 + s1_ref[...], 0.0)              # padded channels stay exactly 0

    h1_scr[...] = jnp.zeros_like(h1_scr)
    h1_scr[PH:PH + Hh, PW:PW + Wh, :] = h1.reshape(Hh, Wh, cp)

    # ---- conv2 (3x3) + BN2, fused 1x1-skip + BNd, add, ReLU ----
    acc2 = jnp.zeros((hw, cp), f32)
    for k in range(9):
        dy, dx = k // 3, k % 3
        slab = h1_scr[PH - 1 + dy:PH - 1 + dy + Hh,
                      PW - 1 + dx:PW - 1 + dx + Wh, :]
        acc2 = acc2 + jnp.dot(slab.reshape(hw, cp).astype(jnp.bfloat16),
                              w2_ref[k], preferred_element_type=f32)
    skip = pooled.reshape(hw, cin).astype(jnp.bfloat16)
    acc2 = acc2 + jnp.dot(skip, wd_ref[...], preferred_element_type=f32)
    o_ref[0] = jnp.maximum(acc2 + s2_ref[...], 0.0)


# ------------------------------ wrapper (pallas_call) ----------------------------

def down_forward(x_nchw, p):
    """NCHW in -> NCHW out.  Requires even H and W a multiple of 16."""
    x = jnp.transpose(x_nchw, (0, 2, 3, 1)).astype(jnp.float32)  # NHWC
    N, H, W, Cin = x.shape
    assert H % 2 == 0 and W % 16 == 0, "need even H and W multiple of 16"
    Hh, Wh = H // 2, W // 2
    HW = Hh * Wh
    Cp, Cout = p["Cp"], p["Cout"]

    # free row-major reshape grouping each 2x2 pool window:
    #   axis 2 = pool-row pair, lane index = pool-col-pair * Cin + channel
    x2 = x.reshape(N, Hh, 2, Wh, 2 * Cin)

    out = pl.pallas_call(
        down_block_kernel,
        out_shape=jax.ShapeDtypeStruct((N, HW, Cp), jnp.float32),
        grid=(N,),
        in_specs=[
            pl.BlockSpec((1, Hh, 2, Wh, 2 * Cin), lambda n: (n, 0, 0, 0, 0)),
            pl.BlockSpec((9, Cin, Cp), lambda n: (0, 0, 0)),
            pl.BlockSpec((1, Cp), lambda n: (0, 0)),
            pl.BlockSpec((9, Cp, Cp), lambda n: (0, 0, 0)),
            pl.BlockSpec((Cin, Cp), lambda n: (0, 0)),
            pl.BlockSpec((1, Cp), lambda n: (0, 0)),
        ],
        out_specs=pl.BlockSpec((1, HW, Cp), lambda n: (n, 0, 0)),
        scratch_shapes=[
            pltpu.VMEM((Hh + 2 * _HPAD, Wh + 2 * _WPAD, Cin), jnp.float32),
            pltpu.VMEM((Hh + 2 * _HPAD, Wh + 2 * _WPAD, Cp), jnp.float32),
        ],
        compiler_params=pltpu.CompilerParams(dimension_semantics=("parallel",)),
    )(x2, p["w1k"], p["s1k"], p["w2k"], p["wdk"], p["s2k"])

    out = out[:, :, :Cout].reshape(N, Hh, Wh, Cout)        # drop channel padding
    return jnp.transpose(out, (0, 3, 1, 2))                # back to NCHW


# ------------------------------ parameters ---------------------------------------

def init_params(key, Cin, Cout, eps=1e-5):
    ks = jax.random.split(key, 11)
    f32 = jnp.float32
    w1_hwio = 0.1 * jax.random.normal(ks[0], (3, 3, Cin, Cout), f32)
    b1 = 0.1 * jax.random.normal(ks[1], (Cout,), f32)
    g1 = 1.0 + 0.1 * jax.random.normal(ks[2], (Cout,), f32)
    be1 = 0.1 * jax.random.normal(ks[3], (Cout,), f32)
    w2_hwio = 0.1 * jax.random.normal(ks[4], (3, 3, Cout, Cout), f32)
    b2 = 0.1 * jax.random.normal(ks[5], (Cout,), f32)
    g2 = 1.0 + 0.1 * jax.random.normal(ks[6], (Cout,), f32)
    be2 = 0.1 * jax.random.normal(ks[7], (Cout,), f32)
    wd = 0.1 * jax.random.normal(ks[8], (Cin, Cout), f32)      # 1x1 conv, no bias
    gd = 1.0 + 0.1 * jax.random.normal(ks[9], (Cout,), f32)
    bed = 0.1 * jax.random.normal(ks[10], (Cout,), f32)
    mean = jnp.zeros((Cout,), f32)                             # BN running stats (init)
    var = jnp.ones((Cout,), f32)

    def fold(g, b, conv_bias):                                 # eval-mode BN fold
        s = g / jnp.sqrt(var + eps)
        return s, b + (conv_bias - mean) * s

    s1, sh1 = fold(g1, be1, b1)
    s2, sh2 = fold(g2, be2, b2)
    sd, shd = fold(gd, bed, jnp.zeros((Cout,), f32))

    Cp = _round_up(Cout, 128)                                  # lane-dense padded channels

    w1k = (jnp.zeros((9, Cin, Cp), f32)
           .at[:, :, :Cout].set((w1_hwio * s1).reshape(9, Cin, Cout))
           .astype(jnp.bfloat16))
    w2k = (jnp.zeros((9, Cp, Cp), f32)
           .at[:, :Cout, :Cout].set((w2_hwio * s2).reshape(9, Cout, Cout))
           .astype(jnp.bfloat16))
    wdk = (jnp.zeros((Cin, Cp), f32)
           .at[:, :Cout].set(wd * sd)
           .astype(jnp.bfloat16))
    s1k = jnp.zeros((1, Cp), f32).at[0, :Cout].set(sh1)
    s2k = jnp.zeros((1, Cp), f32).at[0, :Cout].set(sh2 + shd)

    return dict(
        # raw params for the pure-JAX reference
        w1_hwio=w1_hwio, b1=b1, g1=g1, be1=be1,
        w2_hwio=w2_hwio, b2=b2, g2=g2, be2=be2,
        wd=wd, gd=gd, bed=bed, mean=mean, var=var, eps=eps,
        # kernel-ready folded / padded / bf16 params
        w1k=w1k, s1k=s1k, w2k=w2k, wdk=wdk, s2k=s2k,
        Cp=Cp, Cout=Cout,
    )


# ------------------------------ pure-JAX reference -------------------------------

def ref_down(x_nchw, p):
    eps = p["eps"]
    x = jnp.transpose(x_nchw, (0, 2, 3, 1)).astype(jnp.float32)
    N, H, W, C = x.shape
    xp = x.reshape(N, H // 2, 2, W // 2, 2, C).max(axis=(2, 4))

    def conv3x3(v, w):
        return jax.lax.conv_general_dilated(
            v, w, (1, 1), "SAME", dimension_numbers=("NHWC", "HWIO", "NHWC"))

    def bn(v, g, b):
        return (v - p["mean"]) / jnp.sqrt(p["var"] + eps) * g + b

    h = jnp.maximum(bn(conv3x3(xp, p["w1_hwio"]) + p["b1"], p["g1"], p["be1"]), 0.0)
    h2 = bn(conv3x3(h, p["w2_hwio"]) + p["b2"], p["g2"], p["be2"])
    ident = bn(jnp.einsum("nhwc,co->nhwo", xp, p["wd"]), p["gd"], p["bed"])
    out = jnp.maximum(h2 + ident, 0.0)
    return jnp.transpose(out, (0, 3, 1, 2))


if __name__ == "__main__":
    key = jax.random.PRNGKey(0)
    k_x, k_p = jax.random.split(key)

    N, Cin, H, W = 2, 4, 16, 16
    Cout = 8
    x = jax.random.normal(k_x, (N, Cin, H, W), jnp.float32)
    params = init_params(k_p, Cin, Cout)

    out = jax.block_until_ready(down_forward(x, params))     # (N, Cout, H//2, W//2)

    ref = ref_down(x, params)
    assert out.shape == (N, Cout, H // 2, W // 2), out.shape
    # bf16 MXU operands (f32 accumulation) vs. the f32 reference => loosened tolerance.
    assert jnp.allclose(out, ref, atol=5e-2, rtol=5e-2), \
        float(jnp.max(jnp.abs(out - ref)))

    print("KERNEL_OK")
</pallas_src>

<mosaic_0001>
module attributes {stable_mosaic.version = 11 : i64} {
  func.func @down_block_kernel(%arg0: i32, %arg1: memref<1x8x2x8x8xf32, #tpu.memory_space<vmem>>, %arg2: memref<9x4x128xbf16, #tpu.memory_space<vmem>>, %arg3: memref<1x128xf32, #tpu.memory_space<vmem>>, %arg4: memref<9x128x128xbf16, #tpu.memory_space<vmem>>, %arg5: memref<4x128xbf16, #tpu.memory_space<vmem>>, %arg6: memref<1x128xf32, #tpu.memory_space<vmem>>, %arg7: memref<1x64x128xf32, #tpu.memory_space<vmem>>, %arg8: memref<10x24x4xf32, #tpu.memory_space<vmem>>, %arg9: memref<10x24x128xf32, #tpu.memory_space<vmem>>) attributes {dimension_semantics = [#tpu.dimension_semantics<parallel>], iteration_bounds = array<i64: 2>, scalar_prefetch = 0 : i64, scratch_operands = 2 : i64, tpu.core_type = #tpu.core_type<tc>, window_params = [{transform_indices = @transform_0, window_bounds = array<i64: 1, 8, 2, 8, 8>}, {pipeline_mode = #tpu.pipeline_mode<synchronous>, transform_indices = @transform_1, window_bounds = array<i64: 9, 4, 128>}, {pipeline_mode = #tpu.pipeline_mode<synchronous>, transform_indices = @transform_2, window_bounds = array<i64: 1, 128>}, {pipeline_mode = #tpu.pipeline_mode<synchronous>, transform_indices = @transform_3, window_bounds = array<i64: 9, 128, 128>}, {pipeline_mode = #tpu.pipeline_mode<synchronous>, transform_indices = @transform_4, window_bounds = array<i64: 4, 128>}, {pipeline_mode = #tpu.pipeline_mode<synchronous>, transform_indices = @transform_5, window_bounds = array<i64: 1, 128>}, {transform_indices = @transform_6, window_bounds = array<i64: 1, 64, 128>}]} {
    %c0 = arith.constant 0 : index
    %c0_0 = arith.constant 0 : index
    %c0_1 = arith.constant 0 : index
    %c0_2 = arith.constant 0 : index
    %c0_3 = arith.constant 0 : index
    %0 = vector.load %arg1[%c0, %c0_0, %c0_1, %c0_2, %c0_3] : memref<1x8x2x8x8xf32, #tpu.memory_space<vmem>>, vector<1x8x1x8x8xf32>
    %1 = vector.shape_cast %0 : vector<1x8x1x8x8xf32> to vector<8x8x8xf32>
    %c0_4 = arith.constant 0 : index
    %c0_5 = arith.constant 0 : index
    %c1 = arith.constant 1 : index
    %c0_6 = arith.constant 0 : index
    %c0_7 = arith.constant 0 : index
    %2 = vector.load %arg1[%c0_4, %c0_5, %c1, %c0_6, %c0_7] : memref<1x8x2x8x8xf32, #tpu.memory_space<vmem>>, vector<1x8x1x8x8xf32>
    %3 = vector.shape_cast %2 : vector<1x8x1x8x8xf32> to vector<8x8x8xf32>
    %4 = arith.maximumf %1, %3 : vector<8x8x8xf32>
    %5 = vector.extract_strided_slice %4 {offsets = [0, 0, 0], sizes = [8, 8, 4], strides = [1, 1, 1]} : vector<8x8x8xf32> to vector<8x8x4xf32>
    %6 = vector.extract_strided_slice %4 {offsets = [0, 0, 4], sizes = [8, 8, 4], strides = [1, 1, 1]} : vector<8x8x8xf32> to vector<8x8x4xf32>
    %7 = arith.maximumf %5, %6 : vector<8x8x4xf32>
    %cst = arith.constant 0.000000e+00 : f32
    %8 = vector.broadcast %cst : f32 to vector<10x24x4xf32>
    %c0_8 = arith.constant 0 : index
    %c0_9 = arith.constant 0 : index
    %c0_10 = arith.constant 0 : index
    %9 = vector.load %arg8[%c0_8, %c0_9, %c0_10] : memref<10x24x4xf32, #tpu.memory_space<vmem>>, vector<10x24x4xf32>
    tpu.vector_store %arg8[%c0_8, %c0_9, %c0_10], %8 {strides = array<i32>} : memref<10x24x4xf32, #tpu.memory_space<vmem>>, vector<10x24x4xf32>,
    %c1_11 = arith.constant 1 : index
    %c8 = arith.constant 8 : index
    %c0_12 = arith.constant 0 : index
    %10 = vector.load %arg8[%c1_11, %c8, %c0_12] : memref<10x24x4xf32, #tpu.memory_space<vmem>>, vector<8x8x4xf32>
    tpu.vector_store %arg8[%c1_11, %c8, %c0_12], %7 {strides = array<i32>} : memref<10x24x4xf32, #tpu.memory_space<vmem>>, vector<8x8x4xf32>,
    %cst_13 = arith.constant 0.000000e+00 : f32
    %11 = vector.broadcast %cst_13 : f32 to vector<64x128xf32>
    %c0_14 = arith.constant 0 : index
    %c7 = arith.constant 7 : index
    %c0_15 = arith.constant 0 : index
    %12 = vector.load %arg8[%c0_14, %c7, %c0_15] : memref<10x24x4xf32, #tpu.memory_space<vmem>>, vector<8x8x4xf32>
    %13 = vector.shape_cast %12 : vector<8x8x4xf32> to vector<64x4xf32>
    %14 = arith.truncf %13 : vector<64x4xf32> to vector<64x4xbf16>
    %c0_16 = arith.constant 0 : index
    %c0_17 = arith.constant 0 : index
    %c0_18 = arith.constant 0 : index
    %15 = vector.load %arg2[%c0_16, %c0_17, %c0_18] : memref<9x4x128xbf16, #tpu.memory_space<vmem>>, vector<1x4x128xbf16>
    %16 = vector.shape_cast %15 : vector<1x4x128xbf16> to vector<4x128xbf16>
    %cst_19 = arith.constant dense<0.000000e+00> : vector<64x128xf32>
    %17 = tpu.matmul %14, %16, %cst_19 {dimension_numbers = #tpu.dot_dimension_numbers<[1], [0], [0], [1], [0, 0, 1, 1], [], []>} : vector<64x4xbf16>, vector<4x128xbf16>, vector<64x128xf32> -> vector<64x128xf32>
    %18 = arith.addf %11, %17 : vector<64x128xf32>
    %c0_20 = arith.constant 0 : index
    %c8_21 = arith.constant 8 : index
    %c0_22 = arith.constant 0 : index
    %19 = vector.load %arg8[%c0_20, %c8_21, %c0_22] : memref<10x24x4xf32, #tpu.memory_space<vmem>>, vector<8x8x4xf32>
    %20 = vector.shape_cast %19 : vector<8x8x4xf32> to vector<64x4xf32>
    %21 = arith.truncf %20 : vector<64x4xf32> to vector<64x4xbf16>
    %c1_23 = arith.constant 1 : index
    %c0_24 = arith.constant 0 : index
    %c0_25 = arith.constant 0 : index
    %22 = vector.load %arg2[%c1_23, %c0_24, %c0_25] : memref<9x4x128xbf16, #tpu.memory_space<vmem>>, vector<1x4x128xbf16>
    %23 = vector.shape_cast %22 : vector<1x4x128xbf16> to vector<4x128xbf16>
    %cst_26 = arith.constant dense<0.000000e+00> : vector<64x128xf32>
    %24 = tpu.matmul %21, %23, %cst_26 {dimension_numbers = #tpu.dot_dimension_numbers<[1], [0], [0], [1], [0, 0, 1, 1], [], []>} : vector<64x4xbf16>, vector<4x128xbf16>, vector<64x128xf32> -> vector<64x128xf32>
    %25 = arith.addf %18, %24 : vector<64x128xf32>
    %c0_27 = arith.constant 0 : index
    %c9 = arith.constant 9 : index
    %c0_28 = arith.constant 0 : index
    %26 = vector.load %arg8[%c0_27, %c9, %c0_28] : memref<10x24x4xf32, #tpu.memory_space<vmem>>, vector<8x8x4xf32>
    %27 = vector.shape_cast %26 : vector<8x8x4xf32> to vector<64x4xf32>
    %28 = arith.truncf %27 : vector<64x4xf32> to vector<64x4xbf16>
    %c2 = arith.constant 2 : index
    %c0_29 = arith.constant 0 : index
    %c0_30 = arith.constant 0 : index
    %29 = vector.load %arg2[%c2, %c0_29, %c0_30] : memref<9x4x128xbf16, #tpu.memory_space<vmem>>, vector<1x4x128xbf16>
    %30 = vector.shape_cast %29 : vector<1x4x128xbf16> to vector<4x128xbf16>
    %cst_31 = arith.constant dense<0.000000e+00> : vector<64x128xf32>
    %31 = tpu.matmul %28, %30, %cst_31 {dimension_numbers = #tpu.dot_dimension_numbers<[1], [0], [0], [1], [0, 0, 1, 1], [], []>} : vector<64x4xbf16>, vector<4x128xbf16>, vector<64x128xf32> -> vector<64x128xf32>
    %32 = arith.addf %25, %31 : vector<64x128xf32>
    %c1_32 = arith.constant 1 : index
    %c7_33 = arith.constant 7 : index
    %c0_34 = arith.constant 0 : index
    %33 = vector.load %arg8[%c1_32, %c7_33, %c0_34] : memref<10x24x4xf32, #tpu.memory_space<vmem>>, vector<8x8x4xf32>
    %34 = vector.shape_cast %33 : vector<8x8x4xf32> to vector<64x4xf32>
    %35 = arith.truncf %34 : vector<64x4xf32> to vector<64x4xbf16>
    %c3 = arith.constant 3 : index
    %c0_35 = arith.constant 0 : index
    %c0_36 = arith.constant 0 : index
    %36 = vector.load %arg2[%c3, %c0_35, %c0_36] : memref<9x4x128xbf16, #tpu.memory_space<vmem>>, vector<1x4x128xbf16>
    %37 = vector.shape_cast %36 : vector<1x4x128xbf16> to vector<4x128xbf16>
    %cst_37 = arith.constant dense<0.000000e+00> : vector<64x128xf32>
    %38 = tpu.matmul %35, %37, %cst_37 {dimension_numbers = #tpu.dot_dimension_numbers<[1], [0], [0], [1], [0, 0, 1, 1], [], []>} : vector<64x4xbf16>, vector<4x128xbf16>, vector<64x128xf32> -> vector<64x128xf32>
    %39 = arith.addf %32, %38 : vector<64x128xf32>
    %c1_38 = arith.constant 1 : index
    %c8_39 = arith.constant 8 : index
    %c0_40 = arith.constant 0 : index
    %40 = vector.load %arg8[%c1_38, %c8_39, %c0_40] : memref<10x24x4xf32, #tpu.memory_space<vmem>>, vector<8x8x4xf32>
    %41 = vector.shape_cast %40 : vector<8x8x4xf32> to vector<64x4xf32>
    %42 = arith.truncf %41 : vector<64x4xf32> to vector<64x4xbf16>
    %c4 = arith.constant 4 : index
    %c0_41 = arith.constant 0 : index
    %c0_42 = arith.constant 0 : index
    %43 = vector.load %arg2[%c4, %c0_41, %c0_42] : memref<9x4x128xbf16, #tpu.memory_space<vmem>>, vector<1x4x128xbf16>
    %44 = vector.shape_cast %43 : vector<1x4x128xbf16> to vector<4x128xbf16>
    %cst_43 = arith.constant dense<0.000000e+00> : vector<64x128xf32>
    %45 = tpu.matmul %42, %44, %cst_43 {dimension_numbers = #tpu.dot_dimension_numbers<[1], [0], [0], [1], [0, 0, 1, 1], [], []>} : vector<64x4xbf16>, vector<4x128xbf16>, vector<64x128xf32> -> vector<64x128xf32>
    %46 = arith.addf %39, %45 : vector<64x128xf32>
    %c1_44 = arith.constant 1 : index
    %c9_45 = arith.constant 9 : index
    %c0_46 = arith.constant 0 : index
    %47 = vector.load %arg8[%c1_44, %c9_45, %c0_46] : memref<10x24x4xf32, #tpu.memory_space<vmem>>, vector<8x8x4xf32>
    %48 = vector.shape_cast %47 : vector<8x8x4xf32> to vector<64x4xf32>
    %49 = arith.truncf %48 : vector<64x4xf32> to vector<64x4xbf16>
    %c5 = arith.constant 5 : index
    %c0_47 = arith.constant 0 : index
    %c0_48 = arith.constant 0 : index
    %50 = vector.load %arg2[%c5, %c0_47, %c0_48] : memref<9x4x128xbf16, #tpu.memory_space<vmem>>, vector<1x4x128xbf16>
    %51 = vector.shape_cast %50 : vector<1x4x128xbf16> to vector<4x128xbf16>
    %cst_49 = arith.constant dense<0.000000e+00> : vector<64x128xf32>
    %52 = tpu.matmul %49, %51, %cst_49 {dimension_numbers = #tpu.dot_dimension_numbers<[1], [0], [0], [1], [0, 0, 1, 1], [], []>} : vector<64x4xbf16>, vector<4x128xbf16>, vector<64x128xf32> -> vector<64x128xf32>
    %53 = arith.addf %46, %52 : vector<64x128xf32>
    %c2_50 = arith.constant 2 : index
    %c7_51 = arith.constant 7 : index
    %c0_52 = arith.constant 0 : index
    %54 = vector.load %arg8[%c2_50, %c7_51, %c0_52] : memref<10x24x4xf32, #tpu.memory_space<vmem>>, vector<8x8x4xf32>
    %55 = vector.shape_cast %54 : vector<8x8x4xf32> to vector<64x4xf32>
    %56 = arith.truncf %55 : vector<64x4xf32> to vector<64x4xbf16>
    %c6 = arith.constant 6 : index
    %c0_53 = arith.constant 0 : index
    %c0_54 = arith.constant 0 : index
    %57 = vector.load %arg2[%c6, %c0_53, %c0_54] : memref<9x4x128xbf16, #tpu.memory_space<vmem>>, vector<1x4x128xbf16>
    %58 = vector.shape_cast %57 : vector<1x4x128xbf16> to vector<4x128xbf16>
    %cst_55 = arith.constant dense<0.000000e+00> : vector<64x128xf32>
    %59 = tpu.matmul %56, %58, %cst_55 {dimension_numbers = #tpu.dot_dimension_numbers<[1], [0], [0], [1], [0, 0, 1, 1], [], []>} : vector<64x4xbf16>, vector<4x128xbf16>, vector<64x128xf32> -> vector<64x128xf32>
    %60 = arith.addf %53, %59 : vector<64x128xf32>
    %c2_56 = arith.constant 2 : index
    %c8_57 = arith.constant 8 : index
    %c0_58 = arith.constant 0 : index
    %61 = vector.load %arg8[%c2_56, %c8_57, %c0_58] : memref<10x24x4xf32, #tpu.memory_space<vmem>>, vector<8x8x4xf32>
    %62 = vector.shape_cast %61 : vector<8x8x4xf32> to vector<64x4xf32>
    %63 = arith.truncf %62 : vector<64x4xf32> to vector<64x4xbf16>
    %c7_59 = arith.constant 7 : index
    %c0_60 = arith.constant 0 : index
    %c0_61 = arith.constant 0 : index
    %64 = vector.load %arg2[%c7_59, %c0_60, %c0_61] : memref<9x4x128xbf16, #tpu.memory_space<vmem>>, vector<1x4x128xbf16>
    %65 = vector.shape_cast %64 : vector<1x4x128xbf16> to vector<4x128xbf16>
    %cst_62 = arith.constant dense<0.000000e+00> : vector<64x128xf32>
    %66 = tpu.matmul %63, %65, %cst_62 {dimension_numbers = #tpu.dot_dimension_numbers<[1], [0], [0], [1], [0, 0, 1, 1], [], []>} : vector<64x4xbf16>, vector<4x128xbf16>, vector<64x128xf32> -> vector<64x128xf32>
    %67 = arith.addf %60, %66 : vector<64x128xf32>
    %c2_63 = arith.constant 2 : index
    %c9_64 = arith.constant 9 : index
    %c0_65 = arith.constant 0 : index
    %68 = vector.load %arg8[%c2_63, %c9_64, %c0_65] : memref<10x24x4xf32, #tpu.memory_space<vmem>>, vector<8x8x4xf32>
    %69 = vector.shape_cast %68 : vector<8x8x4xf32> to vector<64x4xf32>
    %70 = arith.truncf %69 : vector<64x4xf32> to vector<64x4xbf16>
    %c8_66 = arith.constant 8 : index
    %c0_67 = arith.constant 0 : index
    %c0_68 = arith.constant 0 : index
    %71 = vector.load %arg2[%c8_66, %c0_67, %c0_68] : memref<9x4x128xbf16, #tpu.memory_space<vmem>>, vector<1x4x128xbf16>
    %72 = vector.shape_cast %71 : vector<1x4x128xbf16> to vector<4x128xbf16>
    %cst_69 = arith.constant dense<0.000000e+00> : vector<64x128xf32>
    %73 = tpu.matmul %70, %72, %cst_69 {dimension_numbers = #tpu.dot_dimension_numbers<[1], [0], [0], [1], [0, 0, 1, 1], [], []>} : vector<64x4xbf16>, vector<4x128xbf16>, vector<64x128xf32> -> vector<64x128xf32>
    %74 = arith.addf %67, %73 : vector<64x128xf32>
    %c0_70 = arith.constant 0 : index
    %c0_71 = arith.constant 0 : index
    %75 = vector.load %arg3[%c0_70, %c0_71] : memref<1x128xf32, #tpu.memory_space<vmem>>, vector<1x128xf32>
    %76 = vector.broadcast %75 : vector<1x128xf32> to vector<64x128xf32>
    %77 = arith.addf %74, %76 : vector<64x128xf32>
    %cst_72 = arith.constant 0.000000e+00 : f32
    %78 = vector.broadcast %cst_72 : f32 to vector<64x128xf32>
    %79 = arith.maximumf %77, %78 : vector<64x128xf32>
    %cst_73 = arith.constant 0.000000e+00 : f32
    %80 = vector.broadcast %cst_73 : f32 to vector<10x24x128xf32>
    %c0_74 = arith.constant 0 : index
    %c0_75 = arith.constant 0 : index
    %c0_76 = arith.constant 0 : index
    %81 = vector.load %arg9[%c0_74, %c0_75, %c0_76] : memref<10x24x128xf32, #tpu.memory_space<vmem>>, vector<10x24x128xf32>
    tpu.vector_store %arg9[%c0_74, %c0_75, %c0_76], %80 {strides = array<i32>} : memref<10x24x128xf32, #tpu.memory_space<vmem>>, vector<10x24x128xf32>,
    %82 = vector.shape_cast %79 : vector<64x128xf32> to vector<8x8x128xf32>
    %c1_77 = arith.constant 1 : index
    %c8_78 = arith.constant 8 : index
    %c0_79 = arith.constant 0 : index
    %83 = vector.load %arg9[%c1_77, %c8_78, %c0_79] : memref<10x24x128xf32, #tpu.memory_space<vmem>>, vector<8x8x128xf32>
    tpu.vector_store %arg9[%c1_77, %c8_78, %c0_79], %82 {strides = array<i32>} : memref<10x24x128xf32, #tpu.memory_space<vmem>>, vector<8x8x128xf32>,
    %cst_80 = arith.constant 0.000000e+00 : f32
    %84 = vector.broadcast %cst_80 : f32 to vector<64x128xf32>
    %c0_81 = arith.constant 0 : index
    %c7_82 = arith.constant 7 : index
    %c0_83 = arith.constant 0 : index
    %85 = vector.load %arg9[%c0_81, %c7_82, %c0_83] : memref<10x24x128xf32, #tpu.memory_space<vmem>>, vector<8x8x128xf32>
    %86 = vector.shape_cast %85 : vector<8x8x128xf32> to vector<64x128xf32>
    %87 = arith.truncf %86 : vector<64x128xf32> to vector<64x128xbf16>
    %c0_84 = arith.constant 0 : index
    %c0_85 = arith.constant 0 : index
    %c0_86 = arith.constant 0 : index
    %88 = vector.load %arg4[%c0_84, %c0_85, %c0_86] : memref<9x128x128xbf16, #tpu.memory_space<vmem>>, vector<1x128x128xbf16>
    %89 = vector.shape_cast %88 : vector<1x128x128xbf16> to vector<128x128xbf16>
    %cst_87 = arith.constant dense<0.000000e+00> : vector<64x128xf32>
    %90 = tpu.matmul %87, %89, %cst_87 {dimension_numbers = #tpu.dot_dimension_numbers<[1], [0], [0], [1], [0, 0, 1, 1], [], []>} : vector<64x128xbf16>, vector<128x128xbf16>, vector<64x128xf32> -> vector<64x128xf32>
    %91 = arith.addf %84, %90 : vector<64x128xf32>
    %c0_88 = arith.constant 0 : index
    %c8_89 = arith.constant 8 : index
    %c0_90 = arith.constant 0 : index
    %92 = vector.load %arg9[%c0_88, %c8_89, %c0_90] : memref<10x24x128xf32, #tpu.memory_space<vmem>>, vector<8x8x128xf32>
    %93 = vector.shape_cast %92 : vector<8x8x128xf32> to vector<64x128xf32>
    %94 = arith.truncf %93 : vector<64x128xf32> to vector<64x128xbf16>
    %c1_91 = arith.constant 1 : index
    %c0_92 = arith.constant 0 : index
    %c0_93 = arith.constant 0 : index
    %95 = vector.load %arg4[%c1_91, %c0_92, %c0_93] : memref<9x128x128xbf16, #tpu.memory_space<vmem>>, vector<1x128x128xbf16>
    %96 = vector.shape_cast %95 : vector<1x128x128xbf16> to vector<128x128xbf16>
    %cst_94 = arith.constant dense<0.000000e+00> : vector<64x128xf32>
    %97 = tpu.matmul %94, %96, %cst_94 {dimension_numbers = #tpu.dot_dimension_numbers<[1], [0], [0], [1], [0, 0, 1, 1], [], []>} : vector<64x128xbf16>, vector<128x128xbf16>, vector<64x128xf32> -> vector<64x128xf32>
    %98 = arith.addf %91, %97 : vector<64x128xf32>
    %c0_95 = arith.constant 0 : index
    %c9_96 = arith.constant 9 : index
    %c0_97 = arith.constant 0 : index
    %99 = vector.load %arg9[%c0_95, %c9_96, %c0_97] : memref<10x24x128xf32, #tpu.memory_space<vmem>>, vector<8x8x128xf32>
    %100 = vector.shape_cast %99 : vector<8x8x128xf32> to vector<64x128xf32>
    %101 = arith.truncf %100 : vector<64x128xf32> to vector<64x128xbf16>
    %c2_98 = arith.constant 2 : index
    %c0_99 = arith.constant 0 : index
    %c0_100 = arith.constant 0 : index
    %102 = vector.load %arg4[%c2_98, %c0_99, %c0_100] : memref<9x128x128xbf16, #tpu.memory_space<vmem>>, vector<1x128x128xbf16>
    %103 = vector.shape_cast %102 : vector<1x128x128xbf16> to vector<128x128xbf16>
    %cst_101 = arith.constant dense<0.000000e+00> : vector<64x128xf32>
    %104 = tpu.matmul %101, %103, %cst_101 {dimension_numbers = #tpu.dot_dimension_numbers<[1], [0], [0], [1], [0, 0, 1, 1], [], []>} : vector<64x128xbf16>, vector<128x128xbf16>, vector<64x128xf32> -> vector<64x128xf32>
    %105 = arith.addf %98, %104 : vector<64x128xf32>
    %c1_102 = arith.constant 1 : index
    %c7_103 = arith.constant 7 : index
    %c0_104 = arith.constant 0 : index
    %106 = vector.load %arg9[%c1_102, %c7_103, %c0_104] : memref<10x24x128xf32, #tpu.memory_space<vmem>>, vector<8x8x128xf32>
    %107 = vector.shape_cast %106 : vector<8x8x128xf32> to vector<64x128xf32>
    %108 = arith.truncf %107 : vector<64x128xf32> to vector<64x128xbf16>
    %c3_105 = arith.constant 3 : index
    %c0_106 = arith.constant 0 : index
    %c0_107 = arith.constant 0 : index
    %109 = vector.load %arg4[%c3_105, %c0_106, %c0_107] : memref<9x128x128xbf16, #tpu.memory_space<vmem>>, vector<1x128x128xbf16>
    %110 = vector.shape_cast %109 : vector<1x128x128xbf16> to vector<128x128xbf16>
    %cst_108 = arith.constant dense<0.000000e+00> : vector<64x128xf32>
    %111 = tpu.matmul %108, %110, %cst_108 {dimension_numbers = #tpu.dot_dimension_numbers<[1], [0], [0], [1], [0, 0, 1, 1], [], []>} : vector<64x128xbf16>, vector<128x128xbf16>, vector<64x128xf32> -> vector<64x128xf32>
    %112 = arith.addf %105, %111 : vector<64x128xf32>
    %c1_109 = arith.constant 1 : index
    %c8_110 = arith.constant 8 : index
    %c0_111 = arith.constant 0 : index
    %113 = vector.load %arg9[%c1_109, %c8_110, %c0_111] : memref<10x24x128xf32, #tpu.memory_space<vmem>>, vector<8x8x128xf32>
    %114 = vector.shape_cast %113 : vector<8x8x128xf32> to vector<64x128xf32>
    %115 = arith.truncf %114 : vector<64x128xf32> to vector<64x128xbf16>
    %c4_112 = arith.constant 4 : index
    %c0_113 = arith.constant 0 : index
    %c0_114 = arith.constant 0 : index
    %116 = vector.load %arg4[%c4_112, %c0_113, %c0_114] : memref<9x128x128xbf16, #tpu.memory_space<vmem>>, vector<1x128x128xbf16>
    %117 = vector.shape_cast %116 : vector<1x128x128xbf16> to vector<128x128xbf16>
    %cst_115 = arith.constant dense<0.000000e+00> : vector<64x128xf32>
    %118 = tpu.matmul %115, %117, %cst_115 {dimension_numbers = #tpu.dot_dimension_numbers<[1], [0], [0], [1], [0, 0, 1, 1], [], []>} : vector<64x128xbf16>, vector<128x128xbf16>, vector<64x128xf32> -> vector<64x128xf32>
    %119 = arith.addf %112, %118 : vector<64x128xf32>
    %c1_116 = arith.constant 1 : index
    %c9_117 = arith.constant 9 : index
    %c0_118 = arith.constant 0 : index
    %120 = vector.load %arg9[%c1_116, %c9_117, %c0_118] : memref<10x24x128xf32, #tpu.memory_space<vmem>>, vector<8x8x128xf32>
    %121 = vector.shape_cast %120 : vector<8x8x128xf32> to vector<64x128xf32>
    %122 = arith.truncf %121 : vector<64x128xf32> to vector<64x128xbf16>
    %c5_119 = arith.constant 5 : index
    %c0_120 = arith.constant 0 : index
    %c0_121 = arith.constant 0 : index
    %123 = vector.load %arg4[%c5_119, %c0_120, %c0_121] : memref<9x128x128xbf16, #tpu.memory_space<vmem>>, vector<1x128x128xbf16>
    %124 = vector.shape_cast %123 : vector<1x128x128xbf16> to vector<128x128xbf16>
    %cst_122 = arith.constant dense<0.000000e+00> : vector<64x128xf32>
    %125 = tpu.matmul %122, %124, %cst_122 {dimension_numbers = #tpu.dot_dimension_numbers<[1], [0], [0], [1], [0, 0, 1, 1], [], []>} : vector<64x128xbf16>, vector<128x128xbf16>, vector<64x128xf32> -> vector<64x128xf32>
    %126 = arith.addf %119, %125 : vector<64x128xf32>
    %c2_123 = arith.constant 2 : index
    %c7_124 = arith.constant 7 : index
    %c0_125 = arith.constant 0 : index
    %127 = vector.load %arg9[%c2_123, %c7_124, %c0_125] : memref<10x24x128xf32, #tpu.memory_space<vmem>>, vector<8x8x128xf32>
    %128 = vector.shape_cast %127 : vector<8x8x128xf32> to vector<64x128xf32>
    %129 = arith.truncf %128 : vector<64x128xf32> to vector<64x128xbf16>
    %c6_126 = arith.constant 6 : index
    %c0_127 = arith.constant 0 : index
    %c0_128 = arith.constant 0 : index
    %130 = vector.load %arg4[%c6_126, %c0_127, %c0_128] : memref<9x128x128xbf16, #tpu.memory_space<vmem>>, vector<1x128x128xbf16>
    %131 = vector.shape_cast %130 : vector<1x128x128xbf16> to vector<128x128xbf16>
    %cst_129 = arith.constant dense<0.000000e+00> : vector<64x128xf32>
    %132 = tpu.matmul %129, %131, %cst_129 {dimension_numbers = #tpu.dot_dimension_numbers<[1], [0], [0], [1], [0, 0, 1, 1], [], []>} : vector<64x128xbf16>, vector<128x128xbf16>, vector<64x128xf32> -> vector<64x128xf32>
    %133 = arith.addf %126, %132 : vector<64x128xf32>
    %c2_130 = arith.constant 2 : index
    %c8_131 = arith.constant 8 : index
    %c0_132 = arith.constant 0 : index
    %134 = vector.load %arg9[%c2_130, %c8_131, %c0_132] : memref<10x24x128xf32, #tpu.memory_space<vmem>>, vector<8x8x128xf32>
    %135 = vector.shape_cast %134 : vector<8x8x128xf32> to vector<64x128xf32>
    %136 = arith.truncf %135 : vector<64x128xf32> to vector<64x128xbf16>
    %c7_133 = arith.constant 7 : index
    %c0_134 = arith.constant 0 : index
    %c0_135 = arith.constant 0 : index
    %137 = vector.load %arg4[%c7_133, %c0_134, %c0_135] : memref<9x128x128xbf16, #tpu.memory_space<vmem>>, vector<1x128x128xbf16>
    %138 = vector.shape_cast %137 : vector<1x128x128xbf16> to vector<128x128xbf16>
    %cst_136 = arith.constant dense<0.000000e+00> : vector<64x128xf32>
    %139 = tpu.matmul %136, %138, %cst_136 {dimension_numbers = #tpu.dot_dimension_numbers<[1], [0], [0], [1], [0, 0, 1, 1], [], []>} : vector<64x128xbf16>, vector<128x128xbf16>, vector<64x128xf32> -> vector<64x128xf32>
    %140 = arith.addf %133, %139 : vector<64x128xf32>
    %c2_137 = arith.constant 2 : index
    %c9_138 = arith.constant 9 : index
    %c0_139 = arith.constant 0 : index
    %141 = vector.load %arg9[%c2_137, %c9_138, %c0_139] : memref<10x24x128xf32, #tpu.memory_space<vmem>>, vector<8x8x128xf32>
    %142 = vector.shape_cast %141 : vector<8x8x128xf32> to vector<64x128xf32>
    %143 = arith.truncf %142 : vector<64x128xf32> to vector<64x128xbf16>
    %c8_140 = arith.constant 8 : index
    %c0_141 = arith.constant 0 : index
    %c0_142 = arith.constant 0 : index
    %144 = vector.load %arg4[%c8_140, %c0_141, %c0_142] : memref<9x128x128xbf16, #tpu.memory_space<vmem>>, vector<1x128x128xbf16>
    %145 = vector.shape_cast %144 : vector<1x128x128xbf16> to vector<128x128xbf16>
    %cst_143 = arith.constant dense<0.000000e+00> : vector<64x128xf32>
    %146 = tpu.matmul %143, %145, %cst_143 {dimension_numbers = #tpu.dot_dimension_numbers<[1], [0], [0], [1], [0, 0, 1, 1], [], []>} : vector<64x128xbf16>, vector<128x128xbf16>, vector<64x128xf32> -> vector<64x128xf32>
    %147 = arith.addf %140, %146 : vector<64x128xf32>
    %148 = vector.shape_cast %7 : vector<8x8x4xf32> to vector<64x4xf32>
    %149 = arith.truncf %148 : vector<64x4xf32> to vector<64x4xbf16>
    %c0_144 = arith.constant 0 : index
    %c0_145 = arith.constant 0 : index
    %150 = vector.load %arg5[%c0_144, %c0_145] : memref<4x128xbf16, #tpu.memory_space<vmem>>, vector<4x128xbf16>
    %cst_146 = arith.constant dense<0.000000e+00> : vector<64x128xf32>
    %151 = tpu.matmul %149, %150, %cst_146 {dimension_numbers = #tpu.dot_dimension_numbers<[1], [0], [0], [1], [0, 0, 1, 1], [], []>} : vector<64x4xbf16>, vector<4x128xbf16>, vector<64x128xf32> -> vector<64x128xf32>
    %152 = arith.addf %147, %151 : vector<64x128xf32>
    %c0_147 = arith.constant 0 : index
    %c0_148 = arith.constant 0 : index
    %153 = vector.load %arg6[%c0_147, %c0_148] : memref<1x128xf32, #tpu.memory_space<vmem>>, vector<1x128xf32>
    %154 = vector.broadcast %153 : vector<1x128xf32> to vector<64x128xf32>
    %155 = arith.addf %152, %154 : vector<64x128xf32>
    %cst_149 = arith.constant 0.000000e+00 : f32
    %156 = vector.broadcast %cst_149 : f32 to vector<64x128xf32>
    %157 = arith.maximumf %155, %156 : vector<64x128xf32>
    %c0_150 = arith.constant 0 : index
    %c0_151 = arith.constant 0 : index
    %c0_152 = arith.constant 0 : index
    %158 = vector.load %arg7[%c0_150, %c0_151, %c0_152] : memref<1x64x128xf32, #tpu.memory_space<vmem>>, vector<1x64x128xf32>
    %159 = vector.shape_cast %158 : vector<1x64x128xf32> to vector<64x128xf32>
    %160 = vector.shape_cast %157 : vector<64x128xf32> to vector<1x64x128xf32>
    tpu.vector_store %arg7[%c0_150, %c0_151, %c0_152], %160 {strides = array<i32>} : memref<1x64x128xf32, #tpu.memory_space<vmem>>, vector<1x64x128xf32>,
    return
  }
  func.func @transform_0(%arg0: i32) -> (i32, i32, i32, i32, i32) {
    %c0_i32 = arith.constant 0 : i32
    %c0_i32_0 = arith.constant 0 : i32
    %c0_i32_1 = arith.constant 0 : i32
    %c0_i32_2 = arith.constant 0 : i32
    %c0_i32_3 = arith.constant 0 : i32
    return %arg0, %c0_i32, %c0_i32_0, %c0_i32_1, %c0_i32_2 : i32, i32, i32, i32, i32
  }
  func.func @transform_1(%arg0: i32) -> (i32, i32, i32) {
    %c0_i32 = arith.constant 0 : i32
    %c0_i32_0 = arith.constant 0 : i32
    %c0_i32_1 = arith.constant 0 : i32
    %c0_i32_2 = arith.constant 0 : i32
    return %c0_i32, %c0_i32_0, %c0_i32_1 : i32, i32, i32
  }
  func.func @transform_2(%arg0: i32) -> (i32, i32) {
    %c0_i32 = arith.constant 0 : i32
    %c0_i32_0 = arith.constant 0 : i32
    %c0_i32_1 = arith.constant 0 : i32
    return %c0_i32, %c0_i32_0 : i32, i32
  }
  func.func @transform_3(%arg0: i32) -> (i32, i32, i32) {
    %c0_i32 = arith.constant 0 : i32
    %c0_i32_0 = arith.constant 0 : i32
    %c0_i32_1 = arith.constant 0 : i32
    %c0_i32_2 = arith.constant 0 : i32
    return %c0_i32, %c0_i32_0, %c0_i32_1 : i32, i32, i32
  }
  func.func @transform_4(%arg0: i32) -> (i32, i32) {
    %c0_i32 = arith.constant 0 : i32
    %c0_i32_0 = arith.constant 0 : i32
    %c0_i32_1 = arith.constant 0 : i32
    return %c0_i32, %c0_i32_0 : i32, i32
  }
  func.func @transform_5(%arg0: i32) -> (i32, i32) {
    %c0_i32 = arith.constant 0 : i32
    %c0_i32_0 = arith.constant 0 : i32
    %c0_i32_1 = arith.constant 0 : i32
    return %c0_i32, %c0_i32_0 : i32, i32
  }
  func.func @transform_6(%arg0: i32) -> (i32, i32, i32) {
    %c0_i32 = arith.constant 0 : i32
    %c0_i32_0 = arith.constant 0 : i32
    %c0_i32_1 = arith.constant 0 : i32
    return %arg0, %c0_i32, %c0_i32_0 : i32, i32, i32
  }
}

</mosaic_0001>

<bundles_post_ra>
// kernel: tpu_custom_call.1
= control target key start
LH: loop header
LB: loop body
LE: loop exit
PB: predicated region body
PF: predicated region fallthrough
CT: control target
= control target key end

     0   :  { %11 = vsyncpa [#allocation5], 0  ;;  %s4722_s0 = inlined_call_operand.hbm [shape: f32[2,8,2,8,8], index: 0, kind: input, shape index: {}]   ;;  %s4723_s1 = inlined_call_operand.hbm [shape: bf16[9,4,128], index: 1, kind: input, shape index: {}]   ;;  %s4724_s2 = inlined_call_operand.vmem [shape: f32[1,128], index: 2, kind: input, shape index: {}]   ;;  %s4725_s3 = inlined_call_operand.hbm [shape: bf16[9,128,128], index: 3, kind: input, shape index: {}]   ;;  %s4726_s4 = inlined_call_operand.vmem [shape: bf16[4,128], index: 4, kind: input, shape index: {}]   ;;  %s4727_s5 = inlined_call_operand.vmem [shape: f32[1,128], index: 5, kind: input, shape index: {}]   ;;  %s4728_s6 = inlined_call_operand.hbm [shape: f32[2,64,128], index: 6, kind: output, shape index: {}]  }
   0x1   :  { %13 = vsyncpa [#allocation5 + $0x1], 0 }
   0x2   :  { %14 = vsyncpa [#allocation8], 0 }
   0x3   :  { %15 = vsyncpa [#allocation6], 0 }
   0x4   :  { %17 = vsyncpa [#allocation6 + $0x1], 0  ;;  %s4053_s21 = smov 0   ;;  %s4055_s22 = smov 0  }
   0x5   :  { %s4057_s23 = smov 0   ;;  %s4059_s24 = smov 0  }
   0x6 LB: > { %s4074_s25 = sadd.s32 4294967295, %s4002_s24   ;;  %s2934_s26 = sadd.s32 4294967294, %s4002_s24   ;;  %s4002_s24 = sphi %s4059_s24, %s4748_s24   ;;  %s3998_s23 = sphi %s4057_s23, %s4747_s23   ;;  %s3994_s22 = sphi %s4055_s22, %s4746_s22   ;;  %s3990_s21 = sphi %s4053_s21, %s4745_s21  }
   0x7   : > { %p43_p0 = scmp.ne.s32.totalorder %s3994_s22, %s3990_s21  ;;  %p4729_p1 = scmp.eq.s32.totalorder %s4074_s25, 0 }
   0x8   : > { %p178_p3 = scmp.eq.s32.totalorder %s2934_s26, 1  ;;  %p2935_p5 = scmp.ge.s32.totalorder %s4002_s24, 1 }
   0x9   : > { %p4083_p4 = por %p4729_p1, %p43_p0  ;;  %p185_p7 = scmp.lt.s32.totalorder %s4002_s24, 3 }
   0xa   : > { %p4088_p6 = por %p178_p3, %p43_p0  ;;  %s4004_s30 = smov [#allocation7]  }
   0xb   : > { %s4732_s27 = scalar_select %p4083_p4, 1, 0 }
   0xc   : > { %s4733_s28 = scalar_select %p4088_p6, 1, 0 }
   0xd   : > { %p4093_p8 = pnand %p2935_p5, %p185_p7  ;;  %s197_s7 = sshll.u32 %s4004_s30, 4  ;;  %s4097_s7 = int_to_ptr.vmem [resolvable:$true] %s197_s7 }
   0xe   : > { %s4005_s9 = smov [#allocation9]   ;;  %s3846_s13 = scalar_lea.hbm %s4723_s1, 288 }
   0xf   : > { %p3708_p9 = pneg %p4093_p8  ;;  %s213_s10 = sshll.u32 %s4005_s9, 4  ;;  %s4108_s10 = int_to_ptr.vmem [resolvable:$true] %s213_s10 }
  0x10   : > { %p3847_p12 = scmp.ne.s32.totalorder %s4723_s1, %s3846_s13  ;;  %p3853_p5 = scmp.lt.u32.totalorder %s3846_s13, %s4723_s1 }
  0x11   : > { %p4104_p11 = pnand %p3708_p9, %p4729_p1 }
  0x13   : > { %p3848_p13 = pneg %p4104_p11 }
  0x15   : > { %p3849_p0 = pnand %p3848_p13, %p3847_p12 }
  0x17   : > { %p3850_p3 = pneg %p3849_p0 }
  0x19   : > { %p3855_p7 = pnand %p3853_p5, %p3850_p3 }
  0x1b   : > { %3858 = shalt.err (!%p3855_p7)
}
  0x1c   : > { %s3859_s18 = scalar_lea.vmem %s4097_s7, 288  ;;  %p3867_p2 = scmp.lt.s32.totalorder %s4097_s7, %s4097_s7 }
  0x1d   : > { %p3860_p9 = scmp.ne.s32.totalorder %s4097_s7, %s3859_s18  ;;  %p3868_p12 = scmp.lt.s32.totalorder %s3859_s18, %s3859_s18 }
  0x1f   : > { %p3862_p10 = pnand %p3860_p9, %p3848_p13  ;;  %p3869_p0 = por %p3868_p12, %p3867_p2 }
  0x21   : > { %p3863_p1 = pneg %p3862_p10 }
  0x23   : > { %p3870_p6 = pnand %p3869_p0, %p3863_p1 }
  0x25   : > { %3873 = shalt.err (!%p3870_p6)
}
  0x26   : > { %s4006_s19 = smov 32   ;;  %s4007_s20 = smov 2  }
  0x27   : > { %3711 = dma.hbm_to_vmem [thread:$0]  (!%p4104_p11), %s4723_s1, 288, %s4097_s7, [#allocation8], %s4006_s19, %s4006_s19, %s4007_s20  }
  0x28   : > { %s3874_s12 = scalar_lea.hbm %s4725_s3, 9216 }
  0x29   : > { %p3875_p2 = scmp.ne.s32.totalorder %s4725_s3, %s3874_s12  ;;  %p3881_p10 = scmp.lt.u32.totalorder %s3874_s12, %s4725_s3 }
  0x2b   : > { %p3877_p1 = pnand %p3875_p2, %p3848_p13 }
  0x2d   : > { %p3878_p6 = pneg %p3877_p1 }
  0x2f   : > { %p3883_p3 = pnand %p3881_p10, %p3878_p6 }
  0x31   : > { %3886 = shalt.err (!%p3883_p3)
}
  0x32   : > { %s3887_s7 = scalar_lea.vmem %s4108_s10, 9216  ;;  %p3895_p12 = scmp.lt.s32.totalorder %s4108_s10, %s4108_s10 }
  0x33   : > { %p3888_p5 = scmp.ne.s32.totalorder %s4108_s10, %s3887_s7  ;;  %p3896_p0 = scmp.lt.s32.totalorder %s3887_s7, %s3887_s7 }
  0x35   : > { %p3890_p7 = pnand %p3888_p5, %p3848_p13  ;;  %p3897_p2 = por %p3896_p0, %p3895_p12 }
  0x37   : > { %p3891_p9 = pneg %p3890_p7 }
  0x39   : > { %p3898_p1 = pnand %p3897_p2, %p3891_p9 }
  0x3b   : > { %3901 = shalt.err (!%p3898_p1)
}
  0x3c   : > { %s4008_s17 = smov 64   ;;  %s4009_s18 = smov 4  }
  0x3d   : > { %3714 = dma.hbm_to_vmem [thread:$0]  (!%p4104_p11), %s4725_s3, 9216, %s4108_s10, [#allocation8], %s4008_s17, %s4008_s17, %s4009_s18  }
  0x3e   : > { %s4163_s26 = sadd.s32 1, %s4002_s24   ;;  %s30_s9 = sadd.s32 1, %s3998_s23 }
  0x3f   : > { %s27_s30 = ssub.s32 %s4002_s24, %s4163_s26  ;;  %p37_p6 = scmp.ne.s32.totalorder %s3998_s23, %s3994_s22 }
  0x40   : > { %p28_p13 = scmp.eq.s32.totalorder %s27_s30, 0  ;;  %p38_p10 = scmp.eq.s32.totalorder %s4002_s24, 0 }
  0x41   : > { %p4736_p5 = scmp.eq.s32.totalorder %s4074_s25, 1  ;;  %p3725_p9 = scmp.lt.s32.totalorder %s4002_s24, 2 }
  0x42   : > { %s4172_s11 = scalar_select %p28_p13, %s3998_s23, %s30_s9  }
  0x43   : > { %p39_p3 = por %p38_p10, %p37_p6  ;;  %p4176_p7 = por %p4736_p5, %p37_p6 }
  0x44   : > { %s233_s8 = sand.u32 1, %s3998_s23   ;;  %s3074_s10 = sshll.u32 %s4002_s24, 11 }
  0x45   : > { %s4737_s12 = scalar_select %p4176_p7, 1, 0 }
  0x46   : > { %s2939_s13 = sshll.u32 %s233_s8, 7  ;;  %s4186_s16 = scalar_lea.hbm %s4722_s0, %s3074_s10 }
  0x47   : > { %s237_s7 = scalar_lea.vmem [#allocation4], %s2939_s13  ;;  %p4190_p11 = pnand %p3725_p9, %p39_p3 }
  0x48   : > { %s244_s17 = sshll.u32 %s237_s7, 4  ;;  %s4194_s19 = scalar_lea.sflag [#allocation5], %s233_s8  ;;  %s4188_s17 = int_to_ptr.vmem [resolvable:$true] %s244_s17 }
  0x49   : > { %s3902_s20 = scalar_lea.hbm %s4186_s16, 2048  ;;  %p3904_p0 = pneg %p4190_p11 }
  0x4a   : > { %p3903_p12 = scmp.ne.s32.totalorder %s4186_s16, %s3902_s20  ;;  %s3907_s13 = scalar_lea.hbm %s4722_s0, 4096 }
  0x4b   : > { %p3908_p13 = scmp.lt.u32.totalorder %s4186_s16, %s4722_s0  ;;  %p3909_p6 = scmp.lt.u32.totalorder %s3907_s13, %s3902_s20 }
  0x4c   : > { %p3905_p2 = pnand %p3904_p0, %p3903_p12  ;;  %p3911_p3 = scmp.lt.u32.totalorder %s3902_s20, %s4186_s16 }
  0x4d   : > { %p3910_p10 = por %p3909_p6, %p3908_p13 }
  0x4e   : > { %p3906_p1 = pneg %p3905_p2 }
  0x4f   : > { %p3912_p5 = por %p3911_p3, %p3910_p10 }
  0x51   : > { %p3913_p9 = pnand %p3912_p5, %p3906_p1 }
  0x53   : > { %3916 = shalt.err (!%p3913_p9)
}
  0x54   : > { %s3917_s8 = scalar_lea.vmem %s4188_s17, 2048  ;;  %s4010_s15 = smov [#allocation4]  }
  0x55   : > { %p3918_p12 = scmp.ne.s32.totalorder %s4188_s17, %s3917_s8  ;;  %s3922_s7 = sshll.u32 %s4010_s15, 4  ;;  %s3923_s7 = int_to_ptr.vmem [resolvable:$false] %s3922_s7 }
  0x56   : > { %s3924_s30 = scalar_lea.vmem %s3923_s7, 4096  ;;  %p3925_p4 = scmp.lt.s32.totalorder %s4188_s17, %s3923_s7 }
  0x57   : > { %p3920_p2 = pnand %p3918_p12, %p3904_p0  ;;  %p3926_p13 = scmp.lt.s32.totalorder %s3924_s30, %s3917_s8 }
  0x59   : > { %p3921_p7 = pneg %p3920_p2  ;;  %p3927_p6 = por %p3926_p13, %p3925_p4 }
  0x5b   : > { %p3928_p10 = pnand %p3927_p6, %p3921_p7 }
  0x5d   : > { %3931 = shalt.err (!%p3928_p10)
}
  0x5e   : > { %s4011_s20 = smov 128   ;;  %s4012_s9 = smov 8  }
  0x5f   : > { %3718 = dma.hbm_to_vmem [thread:$0]  (!%p4190_p11), %s4186_s16, 2048, %s4188_s17, %s4194_s19, %s4011_s20, %s4011_s20, %s4012_s9  }
  0x60   : > { %256 = sbr.rel (%p4093_p8) target bundleno = 1037 (0x40d), region = 44  ;;  %s4225_s13 = sand.u32 (!%p4093_p8), 1, %s3994_s22  }
  0x61   : > { %s2943_s10 = sshll.u32 (!%p4093_p8), %s4225_s13, 7  ;;  %s259_s14 = scalar_lea.sflag (!%p4093_p8), [#allocation5], %s4225_s13 }
  0x62   : > { %s4229_s8 = scalar_lea.vmem (!%p4093_p8), [#allocation4], %s2943_s10  ;;  %p4739_p4 = scmp.ne.s32.totalorder (!%p4093_p8), %s4732_s27, 0 }
  0x67   : > { %3977 = dma.done.wait (%p4739_p4), %s259_s14, 2048  }
  0x68   : > { %3979 = vsyncadd (%p4739_p4), %s259_s14, 4294965248  ;;  %p4740_p7 = scmp.eq.s32.totalorder %s4074_s25, 0 }
  0x6a   : > { %3981 = dma.done.wait (%p4740_p7), [#allocation8], 9504   ;;  %p4741_p8 = pmov %p4740_p7 }
  0x6b   : > { %vm365_vm0 = vcmask 31744   ;;  %v4013_v0 = vmov 0.0   ;;  %v302_v1 = vld [vmem:[%s4229_s8 + $0x20] sm:$0xff]  ;;  %v2949_v2 = vld [vmem:[%s4229_s8 + $0x28] sm:$0xff]  ;;  %v303_v6 = vld [vmem:[%s4229_s8 + $0x30] sm:$0xff]  ;;  %s4014_s27 = smov 124  }
  0x6c   : > { %3983 = vsyncadd (%p4741_p8), [#allocation8], 4294957792  ;;  %376 = vst.msk [vmem:[#allocation2 + $0x50] sm:$0xff] %vm365_vm0, %v4013_v0  ;;  %v300_v3 = vld [vmem:[%s4229_s8] sm:$0xff]  ;;  %v319_v4 = vmax.f32 %v302_v1, %v2949_v2  ;;  %v2947_v5 = vld [vmem:[%s4229_s8 + $0x8] sm:$0xff]  ;;  %vm444_vm1 = vcmask 1041408  }
  0x6d   : > { %366 = vst.msk [vmem:[#allocation2] sm:$0xff] %vm365_vm0, %v4013_v0  ;;  %367 = vst.msk [vmem:[#allocation2 + $0x8] sm:$0xff] %vm365_vm0, %v4013_v0  ;;  %v2950_v7 = vld [vmem:[%s4229_s8 + $0x38] sm:$0xff]  ;;  %v317_v8 = vmax.f32 %v300_v3, %v2947_v5  ;;  %v301_v9 = vld [vmem:[%s4229_s8 + $0x10] sm:$0xff]  ;;  %s2946_s7 = sshll.u32 %s4225_s13, 6  ;;  %s3075_s20 = sshll.u32 %s4074_s25, 10 }
  0x6e   : > { %368 = vst.msk [vmem:[#allocation2 + $0x10] sm:$0xff] %vm365_vm0, %v4013_v0  ;;  %369 = vst.msk [vmem:[#allocation2 + $0x18] sm:$0xff] %vm365_vm0, %v4013_v0  ;;  %v2948_v10 = vld [vmem:[%s4229_s8 + $0x18] sm:$0xff]  ;;  %337 = vrot.lane.b32.xlu1 %v319_v4, %s4014_s27  ;;  %v320_v11 = vmax.f32 %v303_v6, %v2950_v7  ;;  %v305_v13 = vld [vmem:[%s4229_s8 + $0x50] sm:$0xff]  ;;  %s4661_s30 = scalar_lea.vmem [#allocation10], %s2946_s7  ;;  %s2829_s25 = scalar_lea.sflag [#allocation6], %s4225_s13 }
  0x6f   : > { %370 = vst.msk [vmem:[#allocation2 + $0x20] sm:$0xff] %vm365_vm0, %v4013_v0  ;;  %371 = vst.msk [vmem:[#allocation2 + $0x28] sm:$0xff] %vm365_vm0, %v4013_v0  ;;  %333 = vrot.lane.b32.xlu0 %v317_v8, %s4014_s27  ;;  %v318_v12 = vmax.f32 %v301_v9, %v2948_v10  ;;  %v2952_v14 = vld [vmem:[%s4229_s8 + $0x58] sm:$0xff]  ;;  %v304_v15 = vld [vmem:[%s4229_s8 + $0x40] sm:$0xff]  ;;  %s2842_s9 = sshll.u32 %s4661_s30, 4  ;;  %p4742_p0 = scmp.ne.s32.totalorder %s4737_s12, 0  ;;  %s4675_s9 = int_to_ptr.vmem [resolvable:$true] %s2842_s9 }
  0x70   : > { %372 = vst.msk [vmem:[#allocation2 + $0x30] sm:$0xff] %vm365_vm0, %v4013_v0  ;;  %373 = vst.msk [vmem:[#allocation2 + $0x38] sm:$0xff] %vm365_vm0, %v4013_v0  ;;  %v2951_v16 = vld [vmem:[%s4229_s8 + $0x48] sm:$0xff]  ;;  %v431_v17 = vld [vmem:[#allocation7 + $0x2] sm:$0x3]  ;;  %v322_v22 = vmax.f32 %v305_v13, %v2952_v14  ;;  %s4015_s29 = smov [#allocation10]  }
  0x71   : > { %374 = vst.msk [vmem:[#allocation2 + $0x40] sm:$0xff] %vm365_vm0, %v4013_v0  ;;  %375 = vst.msk [vmem:[#allocation2 + $0x48] sm:$0xff] %vm365_vm0, %v4013_v0  ;;  %v307_v18 = vld [vmem:[%s4229_s8 + $0x70] sm:$0xff]  ;;  %v2954_v19 = vld [vmem:[%s4229_s8 + $0x78] sm:$0xff]  ;;  %3686 = vmatprep.subr.msk.bf16.mxu0 %vm444_vm1, %v431_v17  ;;  %v446_v20 = vsel %vm444_vm1, %v431_v17, 0  ;;  %v321_v25 = vmax.f32 %v304_v15, %v2951_v16  ;;  %s3936_s16 = sshll.u32 %s4015_s29, 4  ;;  %s3937_s16 = int_to_ptr.vmem [resolvable:$false] %s3936_s16 }
  0x72   : > { %377 = vst.msk [vmem:[#allocation2 + $0x58] sm:$0xff] %vm365_vm0, %v4013_v0  ;;  %378 = vst.msk [vmem:[#allocation2 + $0x60] sm:$0xff] %vm365_vm0, %v4013_v0  ;;  %v417_v21 = vld [vmem:[#allocation7] sm:$0x3]  ;;  %339 = vrot.lane.b32.xlu1 %v320_v11, %s4014_s27  ;;  %v2953_v24 = vld [vmem:[%s4229_s8 + $0x68] sm:$0xff]  ;;  %3235 = vmatpush3.bf16.msra.mxu0 %v446_v20  ;;  %v324_v26 = vmax.f32 %v307_v18, %v2954_v19  ;;  %s3938_s17 = scalar_lea.vmem %s3937_s16, 2048  ;;  %p3939_p5 = scmp.lt.s32.totalorder %s4675_s9, %s3937_s16 }
  0x73   : > { %379 = vst.msk [vmem:[#allocation2 + $0x68] sm:$0xff] %vm365_vm0, %v4013_v0  ;;  %380 = vst.msk [vmem:[#allocation2 + $0x70] sm:$0xff] %vm365_vm0, %v4013_v0  ;;  %v306_v23 = vld [vmem:[%s4229_s8 + $0x60] sm:$0xff]  ;;  %335 = vrot.lane.b32.xlu0 %v318_v12, %s4014_s27  ;;  %3687 = vmatprep.subr.msk.bf16.mxu0 %vm444_vm1, %v417_v21  ;;  %v526_v54 = vsel %vm444_vm1, %v417_v21, 0  ;;  %v3774_v2 = vld [vmem:[#allocation9 + $0x80] sm:$0xff]   ;;  %s4673_s8 = scalar_lea.hbm %s4728_s6, %s3075_s20 }
  0x74   : > { %381 = vst.msk [vmem:[#allocation2 + $0x78] sm:$0xff] %vm365_vm0, %v4013_v0  ;;  %382 = vst.msk [vmem:[#allocation2 + $0x80] sm:$0xff] %vm365_vm0, %v4013_v0  ;;  %v323_v27 = vmax.f32 %v306_v23, %v2953_v24  ;;  %v418_v41 = vld [vmem:[#allocation2 + $0x8] sm:$0xff]  ;;  %v606_v55 = vld [vmem:[#allocation7 + $0x4] sm:$0x3]  ;;  %3372 = vmatprep.subr.bf16.mxu1 %v3774_v2 }
  0x75   : > { %383 = vst.msk [vmem:[#allocation2 + $0x88] sm:$0xff] %vm365_vm0, %v4013_v0  ;;  %384 = vst.msk [vmem:[#allocation2 + $0x90] sm:$0xff] %vm365_vm0, %v4013_v0  ;;  %v405_v59 = vld [vmem:[#allocation2 + $0x7] sm:$0xff]  ;;  %v3776_v3 = vld [vmem:[#allocation9 + $0x88] sm:$0xff]   ;;  %3373 = vmatpush3.bf16.msra.mxu1 %v3774_v2  ;;  %v620_v9 = vsel %vm444_vm1, %v606_v55, 0 }
  0x76   : > { %385 = vst.msk [vmem:[#allocation2 + $0x98] sm:$0xff] %vm365_vm0, %v4013_v0  ;;  %386 = vst.msk [vmem:[#allocation2 + $0xa0] sm:$0xff] %vm365_vm0, %v4013_v0  ;;  %343 = vrot.lane.b32.xlu1 %v322_v22, %s4014_s27  ;;  %3374 = vmatprep.subr.bf16.mxu1 %v3776_v3  ;;  %v3778_v7 = vld [vmem:[#allocation9 + $0x90] sm:$0xff]   ;;  %v3780_v13 = vld [vmem:[#allocation9 + $0x98] sm:$0xff]  }
  0x77   : > { %387 = vst.msk [vmem:[#allocation2 + $0xa8] sm:$0xff] %vm365_vm0, %v4013_v0  ;;  %388 = vst.msk [vmem:[#allocation2 + $0xb0] sm:$0xff] %vm365_vm0, %v4013_v0  ;;  %341 = vrot.lane.b32.xlu0 %v321_v25, %s4014_s27  ;;  %v593_v15 = vld [vmem:[#allocation2 + $0x9] sm:$0xff] }
  0x78   : > { %389 = vst.msk [vmem:[#allocation2 + $0xb8] sm:$0xff] %vm365_vm0, %v4013_v0  ;;  %390 = vst.msk [vmem:[#allocation2 + $0xc0] sm:$0xff] %vm365_vm0, %v4013_v0 }
  0x79   : > { %391 = vst.msk [vmem:[#allocation2 + $0xc8] sm:$0xff] %vm365_vm0, %v4013_v0  ;;  %392 = vst.msk [vmem:[#allocation2 + $0xd0] sm:$0xff] %vm365_vm0, %v4013_v0  ;;  %3375 = vmatpush3.bf16.msra.mxu1 %v3776_v3 }
  0x7a   : > { %393 = vst.msk [vmem:[#allocation2 + $0xd8] sm:$0xff] %vm365_vm0, %v4013_v0  ;;  %394 = vst.msk [vmem:[#allocation2 + $0xe0] sm:$0xff] %vm365_vm0, %v4013_v0  ;;  %347 = vrot.lane.b32.xlu1 %v324_v26, %s4014_s27  ;;  %3376 = vmatprep.subr.bf16.mxu1 %v3778_v7 }
  0x7b   : > { %395 = vst.msk [vmem:[#allocation2 + $0xe8] sm:$0xff] %vm365_vm0, %v4013_v0  ;;  %1331 = vst [vmem:[#allocation3] sm:$0xff] %v4013_v0  ;;  %345 = vrot.lane.b32.xlu0 %v323_v27, %s4014_s27  ;;  %s3932_s27 = scalar_lea.vmem %s4675_s9, 1024 }
  0x7c   : > { %1332 = vst [vmem:[#allocation3 + $0x8] sm:$0xff] %v4013_v0  ;;  %1333 = vst [vmem:[#allocation3 + $0x10] sm:$0xff] %v4013_v0  ;;  %p3933_p11 = scmp.ne.s32.totalorder %s4675_s9, %s3932_s27  ;;  %p3940_p9 = scmp.lt.s32.totalorder %s3938_s17, %s3932_s27 }
  0x7d   : > { %1334 = vst [vmem:[#allocation3 + $0x18] sm:$0xff] %v4013_v0  ;;  %1336 = vst [vmem:[#allocation3 + $0x28] sm:$0xff] %v4013_v0  ;;  %3377 = vmatpush3.bf16.msra.mxu1 %v3778_v7 }
  0x7e   : > { %1337 = vst [vmem:[#allocation3 + $0x30] sm:$0xff] %v4013_v0  ;;  %1339 = vst [vmem:[#allocation3 + $0x40] sm:$0xff] %v4013_v0  ;;  %3378 = vmatprep.subr.bf16.mxu1 %v3780_v13  ;;  %p3934_p1 = pnand %p3933_p11, %p4742_p0  ;;  %p3941_p12 = por %p3940_p9, %p3939_p5 }
  0x7f   : > { %1340 = vst [vmem:[#allocation3 + $0x48] sm:$0xff] %v4013_v0  ;;  %1342 = vst [vmem:[#allocation3 + $0x58] sm:$0xff] %v4013_v0 }
  0x80   : > { %1343 = vst [vmem:[#allocation3 + $0x60] sm:$0xff] %v4013_v0  ;;  %1345 = vst [vmem:[#allocation3 + $0x70] sm:$0xff] %v4013_v0  ;;  %p3935_p3 = pneg %p3934_p1 }
  0x81   : > { %1346 = vst [vmem:[#allocation3 + $0x78] sm:$0xff] %v4013_v0  ;;  %1348 = vst [vmem:[#allocation3 + $0x88] sm:$0xff] %v4013_v0  ;;  %3379 = vmatpush3.bf16.msra.mxu1 %v3780_v13  ;;  %v3779_v13 = vld [vmem:[#allocation9 + $0x58] sm:$0xff]  }
  0x82   : > { %1349 = vst [vmem:[#allocation3 + $0x90] sm:$0xff] %v4013_v0  ;;  %1351 = vst [vmem:[#allocation3 + $0xa0] sm:$0xff] %v4013_v0  ;;  %p3942_p2 = pnand %p3941_p12, %p3935_p3 }
  0x83   : > { %1352 = vst [vmem:[#allocation3 + $0xa8] sm:$0xff] %v4013_v0  ;;  %1354 = vst [vmem:[#allocation3 + $0xb8] sm:$0xff] %v4013_v0 }
  0x84   : > { %1355 = vst [vmem:[#allocation3 + $0xc0] sm:$0xff] %v4013_v0  ;;  %1357 = vst [vmem:[#allocation3 + $0xd0] sm:$0xff] %v4013_v0 }
  0x85   : > { %1358 = vst [vmem:[#allocation3 + $0xd8] sm:$0xff] %v4013_v0  ;;  %1359 = vst [vmem:[#allocation3 + $0xe0] sm:$0xff] %v4013_v0 }
  0x86   : > { %1360 = vst [vmem:[#allocation3 + $0xe8] sm:$0xff] %v4013_v0 }
  0xe0   : > { %v338_v28 = vpop.permute.xlu1 %337 }
  0xe1   : > { %v4340_v29 = vmax.f32 %v319_v4, %v338_v28  ;;  %v334_v30 = vpop.permute.xlu0 %333 }
  0xe2   : > { %v4342_v31 = vmax.f32 %v317_v8, %v334_v30 }
  0xe3   : > { %399 = vst.msk [vmem:[#allocation2 + $0x50] sm:$0xff] %vm365_vm0, %v4340_v29 }
  0xe4   : > { %397 = vst.msk [vmem:[#allocation2 + $0x20] sm:$0xff] %vm365_vm0, %v4342_v31  ;;  %v340_v32 = vpop.permute.xlu1 %339 }
  0xe5   : > { %v4348_v33 = vmax.f32 %v320_v11, %v340_v32  ;;  %v336_v34 = vpop.permute.xlu0 %335 }
  0xe6   : > { %v4350_v35 = vmax.f32 %v318_v12, %v336_v34  ;;  %v708_v12 = vld [vmem:[#allocation7 + $0x6] sm:$0x3] }
  0xe7   : > { %400 = vst.msk [vmem:[#allocation2 + $0x68] sm:$0xff] %vm365_vm0, %v4348_v33  ;;  %v2705_v36 = vpack.c.bf16 %v4348_v33, %v4340_v29  ;;  %v722_v24 = vsel %vm444_vm1, %v708_v12, 0  ;;  %v3812_v29 = vld [vmem:[#allocation9 + $0x138] sm:$0xff]   ;;  %v3813_v33 = vld [vmem:[#allocation9 + $0x140] sm:$0xff]  }
  0xe8   : > { %398 = vst.msk [vmem:[#allocation2 + $0x38] sm:$0xff] %vm365_vm0, %v4350_v35  ;;  %v2704_v37 = vpack.c.bf16 %v4350_v35, %v4342_v31  ;;  %v344_v38 = vpop.permute.xlu1 %343  ;;  %v3810_v31 = vld [vmem:[#allocation9 + $0x128] sm:$0xff]   ;;  %v3811_v35 = vld [vmem:[#allocation9 + $0x130] sm:$0xff]  }
  0xe9   : > { %v4360_v39 = vmax.f32 %v322_v22, %v344_v38  ;;  %v342_v40 = vpop.permute.xlu0 %341 }
  0xea   : > { %v4362_v42 = vmax.f32 %v321_v25, %v342_v40  ;;  %v4375_v49 = vld [vmem:[#allocation2 + $0x50] sm:$0xff] }
  0xeb   : > { %402 = vst.msk [vmem:[#allocation2 + $0x98] sm:$0xff] %vm365_vm0, %v4360_v39  ;;  %v4366_v43 = vld [vmem:[#allocation2 + $0x20] sm:$0xff]  ;;  %v408_v5 = vld [vmem:[#allocation2 + $0x4f] sm:$0xff] }
  0xec   : > { %401 = vst.msk [vmem:[#allocation2 + $0x80] sm:$0xff] %vm365_vm0, %v4362_v42  ;;  %v2706_v44 = vpack.c.bf16 %v4360_v39, %v4362_v42  ;;  %v348_v45 = vpop.permute.xlu1 %347  ;;  %v426_v46 = vpack.c.bf16 %v4366_v43, %v418_v41  ;;  %v406_v60 = vld [vmem:[#allocation2 + $0x1f] sm:$0xff]  ;;  %v596_v21 = vld [vmem:[#allocation2 + $0x51] sm:$0xff] }
  0xed   : > { %v4373_v47 = vmax.f32 %v324_v26, %v348_v45  ;;  %v346_v48 = vpop.permute.xlu0 %345  ;;  %v413_v1 = vpack.c.bf16 %v406_v60, %v405_v59  ;;  %v594_v16 = vld [vmem:[#allocation2 + $0x21] sm:$0xff]  ;;  %v912_v45 = vld [vmem:[#allocation7 + $0xa] sm:$0x3]  ;;  %v3817_v42 = vld [vmem:[#allocation9 + $0x160] sm:$0xff]  }
  0xee   : > { %v4377_v50 = vmax.f32 %v323_v27, %v346_v48  ;;  %3236 = vmatprep.mubr.msk.bf16.mxu0 %vm365_vm0, %v426_v46  ;;  %v4395_v56 = vld [vmem:[#allocation2 + $0x68] sm:$0xff]  ;;  %v601_v19 = vpack.c.bf16 %v594_v16, %v593_v15  ;;  %v926_v59 = vsel %vm444_vm1, %v912_v45, 0  ;;  %v3783_v15 = vld [vmem:[#allocation9 + $0x68] sm:$0xff]  }
  0xef   : > { %404 = vst.msk [vmem:[#allocation2 + $0xc8] sm:$0xff] %vm365_vm0, %v4373_v47  ;;  %v4382_v51 = vld [vmem:[#allocation2 + $0x38] sm:$0xff]  ;;  %v409_v10 = vld [vmem:[#allocation2 + $0x67] sm:$0xff] }
  0xf0   : > { %403 = vst.msk [vmem:[#allocation2 + $0xb0] sm:$0xff] %vm365_vm0, %v4377_v50  ;;  %v2707_v52 = vpack.c.bf16 %v4373_v47, %v4377_v50  ;;  %v4390_v53 = vpack.c.bf16 %v4375_v49, %v4382_v51  ;;  %v407_v4 = vld [vmem:[#allocation2 + $0x37] sm:$0xff]  ;;  %v597_v25 = vld [vmem:[#allocation2 + $0x69] sm:$0xff]  ;;  %v704_v38 = vpack.c.bf16 %v409_v10, %v408_v5 }
  0xf1   : > { %v4417_v8 = vpack.c.bf16 %v408_v5, %v407_v4  ;;  %v595_v20 = vld [vmem:[#allocation2 + $0x39] sm:$0xff]  ;;  %v810_v27 = vld [vmem:[#allocation7 + $0x8] sm:$0x3]  ;;  %v703_v34 = vpack.c.bf16 %v407_v4, %v406_v60  ;;  %v1219_v5 = vld [vmem:[#allocation7 + $0x10] sm:$0x3] }
  0xf2   : > { %3237 = vmatmul.mubr.msk.bf16.vlgmr.msra.gmra.mrb[0].mxu0 %vm365_vm0, %v4390_v53  ;;  %v4406_v61 = vld [vmem:[#allocation2 + $0x98] sm:$0xff]  ;;  %v4432_v23 = vpack.c.bf16 %v596_v21, %v595_v20  ;;  %v824_v40 = vsel %vm444_vm1, %v810_v27, 0  ;;  %v907_v2 = vpack.c.bf16 %v595_v20, %v594_v16  ;;  %v3786_v20 = vld [vmem:[#allocation9 + $0xb0] sm:$0xff]   ;;  %v3816_v39 = vld [vmem:[#allocation9 + $0x158] sm:$0xff]  }
  0xf3   : > { %3245 = vmatpush3.bf16.msra.mxu0 %v526_v54  ;;  %v4397_v57 = vld [vmem:[#allocation2 + $0x80] sm:$0xff]  ;;  %v411_v17 = vld [vmem:[#allocation2 + $0x97] sm:$0xff]  ;;  %v805_v54 = vpack.c.bf16 %v4382_v51, %v4366_v43  ;;  %v3820_v50 = vld [vmem:[#allocation9 + $0x178] sm:$0xff]  }
  0xf4   : > { %v4401_v58 = vpack.c.bf16 %v4397_v57, %v4395_v56  ;;  %3688 = vmatprep.subr.msk.bf16.mxu0 %vm444_vm1, %v606_v55  ;;  %v410_v6 = vld [vmem:[#allocation2 + $0x7f] sm:$0xff]  ;;  %v806_v55 = vpack.c.bf16 %v4395_v56, %v4375_v49  ;;  %v807_v60 = vpack.c.bf16 %v4406_v61, %v4397_v57  ;;  %v908_v49 = vpack.c.bf16 %v597_v25, %v596_v21  ;;  %v3782_v16 = vld [vmem:[#allocation9 + $0xa0] sm:$0xff]  }
  0xf5   : > { %v4420_v11 = vpack.c.bf16 %v410_v6, %v409_v10  ;;  %v598_v22 = vld [vmem:[#allocation2 + $0x81] sm:$0xff]  ;;  %v599_v30 = vld [vmem:[#allocation2 + $0x99] sm:$0xff]  ;;  %v705_v41 = vpack.c.bf16 %v411_v17, %v410_v6  ;;  %3380 = vmatprep.subr.bf16.mxu1 %v3782_v16 }
  0xf6   : > { %3240 = vmatprep.mubr.msk.bf16.mxu0 %vm365_vm0, %v4401_v58  ;;  %v4435_v26 = vpack.c.bf16 %v598_v22, %v597_v25  ;;  %v702_v46 = vld [vmem:[#allocation2 + $0xc7] sm:$0xff]  ;;  %v909_v57 = vpack.c.bf16 %v599_v30, %v598_v22  ;;  %v1009_v6 = vld [vmem:[#allocation2 + $0xdf] sm:$0xff]  ;;  %3381 = vmatpush3.bf16.msra.mxu1 %v3782_v16  ;;  %v3789_v21 = vld [vmem:[#allocation9] sm:$0xff]  }
  0xf7   : > { %v4408_v62 = vld [vmem:[#allocation2 + $0xb0] sm:$0xff]  ;;  %v804_v43 = vld [vmem:[#allocation2 + $0xc8] sm:$0xff]  ;;  %v1013_v7 = vpack.c.bf16 %v1009_v6, %v702_v46  ;;  %v1111_v10 = vld [vmem:[#allocation2 + $0xe0] sm:$0xff] }
  0xf8   : > { %v4412_v63 = vpack.c.bf16 %v4408_v62, %v4406_v61  ;;  %v412_v14 = vld [vmem:[#allocation2 + $0xaf] sm:$0xff]  ;;  %v808_v51 = vpack.c.bf16 %v804_v43, %v4408_v62  ;;  %v3793_v6 = vld [vmem:[#allocation9 + $0x10] sm:$0xff]  }
  0xf9   : > { %v4427_v18 = vpack.c.bf16 %v412_v14, %v411_v17  ;;  %v600_v28 = vld [vmem:[#allocation2 + $0xb1] sm:$0xff]  ;;  %v706_v48 = vpack.c.bf16 %v702_v46, %v412_v14  ;;  %v1117_v61 = vld [vmem:[#allocation7 + $0xe] sm:$0x3]  ;;  %v3785_v17 = vld [vmem:[#allocation9 + $0x70] sm:$0xff]  }
  0xfa   : > { %3241 = vmatmul.mubr.msk.bf16.gmra.mrb[4].mxu0 %vm365_vm0, %v4412_v63  ;;  %v4442_v32 = vpack.c.bf16 %v600_v28, %v599_v30  ;;  %v906_v3 = vld [vmem:[#allocation2 + $0xc9] sm:$0xff]  ;;  %v1131_v62 = vsel %vm444_vm1, %v1117_v61, 0  ;;  %v3781_v14 = vld [vmem:[#allocation9 + $0x60] sm:$0xff]  }
  0xfb   : > { %3246 = vmatprep.mubr.msk.bf16.mxu0 %vm365_vm0, %v413_v1  ;;  %v1015_v1 = vld [vmem:[#allocation7 + $0xc] sm:$0x3]  ;;  %v910_v4 = vpack.c.bf16 %v906_v3, %v600_v28  ;;  %v3819_v47 = vld [vmem:[#allocation9 + $0x170] sm:$0xff]  }
  0xfc   : > { %v1029_v56 = vsel %vm444_vm1, %v1015_v1, 0  ;;  %v3788_v22 = vld [vmem:[#allocation9 + $0xb8] sm:$0xff]  }
 0x102   : > { %3247 = vmatmul.mubr.msk.bf16.vlgmr.msra.gmra.mrb[0].mxu0 %vm365_vm0, %v4417_v8 }
 0x103   : > { %3255 = vmatpush3.bf16.msra.mxu0 %v620_v9  ;;  %3250 = vmatprep.mubr.msk.bf16.mxu0 %vm365_vm0, %v4420_v11  ;;  %v3773_v9 = vld [vmem:[#allocation9 + $0x40] sm:$0xff]  }
 0x104   : > { %3689 = vmatprep.subr.msk.bf16.mxu0 %vm444_vm1, %v708_v12  ;;  %v3775_v12 = vld [vmem:[#allocation9 + $0x48] sm:$0xff]  }
 0x10a   : > { %3251 = vmatmul.mubr.msk.bf16.gmra.mrb[4].mxu0 %vm365_vm0, %v4427_v18 }
 0x10b   : > { %3256 = vmatprep.mubr.msk.bf16.mxu0 %vm365_vm0, %v601_v19  ;;  %v3787_v19 = vld [vmem:[#allocation9 + $0x78] sm:$0xff]  }
 0x112   : > { %3257 = vmatmul.mubr.msk.bf16.vlgmr.msra.gmra.mrb[0].mxu0 %vm365_vm0, %v4432_v23 }
 0x113   : > { %3265 = vmatpush3.bf16.msra.mxu0 %v722_v24  ;;  %3260 = vmatprep.mubr.msk.bf16.mxu0 %vm365_vm0, %v4435_v26  ;;  %v2991_v24 = vld [vmem:[%s4724_s2] ss:$0 sm:$0xff] }
 0x114   : > { %3690 = vmatprep.subr.msk.bf16.mxu0 %vm444_vm1, %v810_v27 }
 0x11a   : > { %3261 = vmatmul.mubr.msk.bf16.gmra.mrb[4].mxu0 %vm365_vm0, %v4442_v32 }
 0x11b   : > { %3266 = vmatprep.mubr.msk.bf16.mxu0 %vm365_vm0, %v703_v34 }
 0x122   : > { %3267 = vmatmul.mubr.msk.bf16.vlgmr.msra.gmra.mrb[0].mxu0 %vm365_vm0, %v704_v38 }
 0x123   : > { %3275 = vmatpush3.bf16.msra.mxu0 %v824_v40  ;;  %3270 = vmatprep.mubr.msk.bf16.mxu0 %vm365_vm0, %v705_v41 }
 0x124   : > { %3691 = vmatprep.subr.msk.bf16.mxu0 %vm444_vm1, %v912_v45 }
 0x12a   : > { %3271 = vmatmul.mubr.msk.bf16.gmra.mrb[4].mxu0 %vm365_vm0, %v706_v48 }
 0x12b   : > { %3276 = vmatprep.mubr.msk.bf16.mxu0 %vm365_vm0, %v805_v54 }
 0x132   : > { %3277 = vmatmul.mubr.msk.bf16.vlgmr.msra.gmra.mrb[0].mxu0 %vm365_vm0, %v806_v55 }
 0x133   : > { %3285 = vmatpush3.bf16.msra.mxu0 %v926_v59  ;;  %3280 = vmatprep.mubr.msk.bf16.mxu0 %vm365_vm0, %v807_v60  ;;  %v3791_v60 = vld [vmem:[#allocation9 + $0x8] sm:$0xff]  }
 0x134   : > { %3692 = vmatprep.subr.msk.bf16.mxu0 %vm444_vm1, %v1015_v1 }
 0x13a   : > { %3281 = vmatmul.mubr.msk.bf16.gmra.mrb[4].mxu0 %vm365_vm0, %v808_v51 }
 0x13b   : > { %3286 = vmatprep.mubr.msk.bf16.mxu0 %vm365_vm0, %v907_v2 }
 0x142   : > { %3287 = vmatmul.mubr.msk.bf16.vlgmr.msra.gmra.mrb[0].mxu0 %vm365_vm0, %v908_v49 }
 0x143   : > { %3295 = vmatpush3.bf16.msra.mxu0 %v1029_v56  ;;  %3290 = vmatprep.mubr.msk.bf16.mxu0 %vm365_vm0, %v909_v57 }
 0x144   : > { %3693 = vmatprep.subr.msk.bf16.mxu0 %vm444_vm1, %v1117_v61  ;;  %v1653_v61 = vld [vmem:[#allocation3 + $0x9] sm:$0xff] }
 0x14a   : > { %3291 = vmatmul.mubr.msk.bf16.gmra.mrb[4].mxu0 %vm365_vm0, %v910_v4 }
 0x14b   : > { %3296 = vmatprep.mubr.msk.bf16.mxu0 %vm365_vm0, %v4417_v8  ;;  %v1233_v8 = vsel %vm444_vm1, %v1219_v5, 0 }
 0x152   : > { %3297 = vmatmul.mubr.msk.bf16.vlgmr.msra.gmra.mrb[0].mxu0 %vm365_vm0, %v4420_v11  ;;  %v1115_v11 = vpack.c.bf16 %v1111_v10, %v804_v43 }
 0x153   : > { %3305 = vmatpush3.bf16.msra.mxu0 %v1131_v62  ;;  %3300 = vmatprep.mubr.msk.bf16.mxu0 %vm365_vm0, %v4427_v18  ;;  %v3784_v18 = vld [vmem:[#allocation9 + $0xa8] sm:$0xff]  }
 0x154   : > { %3694 = vmatprep.subr.msk.bf16.mxu0 %vm444_vm1, %v1219_v5  ;;  %3382 = vmatprep.subr.bf16.mxu1 %v3784_v18 }
 0x155   : > { %3383 = vmatpush3.bf16.msra.mxu1 %v3784_v18 }
 0x156   : > { %3384 = vmatprep.subr.bf16.mxu1 %v3786_v20 }
 0x159   : > { %3385 = vmatpush3.bf16.msra.mxu1 %v3786_v20 }
 0x15a   : > { %3301 = vmatmul.mubr.msk.bf16.gmra.mrb[4].mxu0 %vm365_vm0, %v1013_v7  ;;  %3386 = vmatprep.subr.bf16.mxu1 %v3788_v22 }
 0x15b   : > { %3306 = vmatprep.mubr.msk.bf16.mxu0 %vm365_vm0, %v4390_v53  ;;  %v3777_v53 = vld [vmem:[#allocation9 + $0x50] sm:$0xff]  }
 0x15d   : > { %3387 = vmatpush3.bf16.msra.mxu1 %v3788_v22 }
 0x162   : > { %3307 = vmatmul.mubr.msk.bf16.vlgmr.msra.gmra.mrb[0].mxu0 %vm365_vm0, %v4401_v58  ;;  %v1213_v58 = vld [vmem:[#allocation2 + $0xe1] sm:$0xff] }
 0x163   : > { %3315 = vmatpush3.bf16.msra.mxu0 %v1233_v8  ;;  %3310 = vmatprep.mubr.msk.bf16.mxu0 %vm365_vm0, %v4412_v63  ;;  %v1217_v63 = vpack.c.bf16 %v1213_v58, %v906_v3 }
 0x164   : > { %3324 = vmatprep.subr.bf16.mxu0 %v3773_v9 }
 0x16a   : > { %3311 = vmatmul.mubr.msk.bf16.gmra.mrb[4].mxu0 %vm365_vm0, %v1115_v11 }
 0x16b   : > { %3316 = vmatprep.mubr.msk.bf16.mxu0 %vm365_vm0, %v4432_v23  ;;  %v4495_v23 = vld [vmem:[#allocation9 + $0xc0] sm:$0xff]  }
 0x16c   : > { %3396 = vmatprep.subr.bf16.mxu1 %v4495_v23 }
 0x172   : > { %3317 = vmatmul.mubr.msk.bf16.vlgmr.msra.gmra.mrb[0].mxu0 %vm365_vm0, %v4435_v26 }
 0x173   : > { %3320 = vmatprep.mubr.msk.bf16.mxu0 %vm365_vm0, %v4442_v32  ;;  %3325 = vmatpush3.bf16.msra.mxu0 %v3773_v9 }
 0x174   : > { %3326 = vmatprep.subr.bf16.mxu0 %v3775_v12 }
 0x177   : > { %3327 = vmatpush3.bf16.msra.mxu0 %v3775_v12 }
 0x178   : > { %3328 = vmatprep.subr.bf16.mxu0 %v3777_v53 }
 0x17a   : > { %3321 = vmatmul.mubr.msk.bf16.gmra.mrb[4].mxu0 %vm365_vm0, %v1217_v63 }
 0x17b   : > { %3329 = vmatpush3.bf16.msra.mxu0 %v3777_v53  ;;  %v1370_v53 = vld [vmem:[#allocation3 + $0x7] sm:$0xff] }
 0x17c   : > { %3330 = vmatprep.subr.bf16.mxu0 %v3779_v13 }
 0x17f   : > { %3331 = vmatpush3.bf16.msra.mxu0 %v3779_v13 }
 0x180   : > { %3332 = vmatprep.subr.bf16.mxu0 %v3781_v14 }
 0x183   : > { %3333 = vmatpush3.bf16.msra.mxu0 %v3781_v14 }
 0x184   : > { %3334 = vmatprep.subr.bf16.mxu0 %v3783_v15 }
 0x187   : > { %3335 = vmatpush3.bf16.msra.mxu0 %v3783_v15  ;;  %v3792_v15 = vld [vmem:[#allocation9 + $0xc8] sm:$0xff]  }
 0x188   : > { %3336 = vmatprep.subr.bf16.mxu0 %v3785_v17 }
 0x18b   : > { %3337 = vmatpush3.bf16.msra.mxu0 %v3785_v17  ;;  %v3795_v17 = vld [vmem:[#allocation9 + $0x18] sm:$0xff]  }
 0x18c   : > { %3338 = vmatprep.subr.bf16.mxu0 %v3787_v19 }
 0x18f   : > { %3339 = vmatpush3.bf16.msra.mxu0 %v3787_v19 }
 0x190   : > { %3348 = vmatprep.subr.bf16.mxu0 %v3789_v21 }
 0x245   : > { %v3318_v25 = vpop.f32.mrb[0].mxu0 }
 0x246   : > { %v1317_v26 = vadd.f32 %v3318_v25, %v2991_v24  ;;  %v1269_v27 = vpop.f32.mrb[1].mxu0 }
 0x247   : > { %v1315_v28 = vadd.f32 %v2991_v24, %v1269_v27  ;;  %v3319_v30 = vpop.f32.mrb[2].mxu0 }
 0x248   : > { %v4501_v32 = vmax.f32 %v1317_v26, 0.0  ;;  %v1318_v34 = vadd.f32 %v3319_v30, %v2991_v24  ;;  %v1272_v38 = vpop.f32.mrb[3].mxu0  ;;  %v3796_v30 = vld [vmem:[#allocation9 + $0xd8] sm:$0xff]  }
 0x249   : > { %v4503_v40 = vmax.f32 %v1315_v28, 0.0  ;;  %v1316_v41 = vadd.f32 %v2991_v24, %v1272_v38  ;;  %v3799_v38 = vld [vmem:[#allocation9 + $0x28] sm:$0xff]  }
 0x24a   : > { %1364 = vst [vmem:[#allocation3 + $0x50] sm:$0xff] %v4501_v32  ;;  %v4506_v45 = vmax.f32 %v1318_v34, 0.0 }
 0x24b   : > { %1362 = vst [vmem:[#allocation3 + $0x20] sm:$0xff] %v4503_v40  ;;  %v4509_v46 = vmax.f32 %v1316_v41, 0.0  ;;  %v1406_v48 = vpack.c.bf16 %v4503_v40, %v4013_v0 }
 0x24c   : > { %1365 = vst [vmem:[#allocation3 + $0x68] sm:$0xff] %v4506_v45  ;;  %v1962_v54 = vpack.c.bf16 %v4506_v45, %v4501_v32 }
 0x24d   : > { %1363 = vst [vmem:[#allocation3 + $0x38] sm:$0xff] %v4509_v46  ;;  %v3322_v55 = vpop.f32.mrb[4].mxu0  ;;  %3340 = vmatprep.mubr.bf16.mxu0 %v1406_v48  ;;  %v4519_v59 = vpack.c.bf16 %v4501_v32, %v4509_v46  ;;  %v1961_v1 = vpack.c.bf16 %v4509_v46, %v4503_v40  ;;  %v3798_v48 = vld [vmem:[#allocation9 + $0xe0] sm:$0xff]   ;;  %v3822_v32 = vld [vmem:[#allocation9 + $0x188] sm:$0xff]   ;;  %v3823_v40 = vld [vmem:[#allocation9 + $0x190] sm:$0xff]  }
 0x24e   : > { %v1321_v43 = vadd.f32 %v3322_v55, %v2991_v24  ;;  %v1285_v51 = vpop.f32.mrb[5].mxu0  ;;  %v3801_v55 = vld [vmem:[#allocation9 + $0x30] sm:$0xff]  }
 0x24f   : > { %v1319_v0 = vadd.f32 %v2991_v24, %v1285_v51  ;;  %v3323_v2 = vpop.f32.mrb[6].mxu0  ;;  %3341 = vmatmul.mubr.bf16.vlgmr.msra.gmra.mrb[8].mxu0 %v4519_v59  ;;  %v3802_v51 = vld [vmem:[#allocation9 + $0xf0] sm:$0xff]  }
 0x250   : > { %v4524_v49 = vmax.f32 %v1321_v43, 0.0  ;;  %v1322_v56 = vadd.f32 %v3323_v2, %v2991_v24  ;;  %v1288_v57 = vpop.f32.mrb[7].mxu0  ;;  %3349 = vmatpush3.bf16.msra.mxu0 %v3789_v21  ;;  %v3794_v21 = vld [vmem:[#allocation9 + $0xd0] sm:$0xff]   ;;  %v3803_v43 = vld [vmem:[#allocation9 + $0x38] sm:$0xff]  }
 0x251   : > { %v4526_v3 = vmax.f32 %v1319_v0, 0.0  ;;  %v1320_v4 = vadd.f32 %v2991_v24, %v1288_v57  ;;  %3350 = vmatprep.subr.bf16.mxu0 %v3791_v60  ;;  %v4537_v9 = vld [vmem:[#allocation3 + $0x51] sm:$0xff]  ;;  %v3797_v24 = vld [vmem:[#allocation9 + $0x20] sm:$0xff]  }
 0x252   : > { %1368 = vst [vmem:[#allocation3 + $0xb0] sm:$0xff] %v4524_v49  ;;  %v4529_v62 = vmax.f32 %v1322_v56, 0.0  ;;  %v4531_v5 = vld [vmem:[#allocation3 + $0x21] sm:$0xff]  ;;  %v2708_v0 = vld [vmem:[%s4726_s4] sm:$0x3] }
 0x253   : > { %1366 = vst [vmem:[#allocation3 + $0x80] sm:$0xff] %v4526_v3  ;;  %v4534_v7 = vmax.f32 %v1320_v4, 0.0  ;;  %v1661_v8 = vpack.c.bf16 %v4531_v5, %v1653_v61  ;;  %v4541_v10 = vpack.c.bf16 %v4526_v3, %v4506_v45  ;;  %v4543_v11 = vld [vmem:[#allocation3 + $0x69] sm:$0xff]  ;;  %v1371_v58 = vld [vmem:[#allocation3 + $0x1f] sm:$0xff] }
 0x254   : > { %1369 = vst [vmem:[#allocation3 + $0xc8] sm:$0xff] %v4529_v62  ;;  %v4546_v12 = vld [vmem:[#allocation3 + $0x39] sm:$0xff]  ;;  %3351 = vmatpush3.bf16.msra.mxu0 %v3791_v60  ;;  %v1964_v63 = vpack.c.bf16 %v4529_v62, %v4524_v49  ;;  %v2112_v13 = vpack.c.bf16 %v4543_v11, %v4537_v9  ;;  %v1378_v20 = vpack.c.bf16 %v1371_v58, %v1370_v53  ;;  %v3800_v60 = vld [vmem:[#allocation9 + $0xe8] sm:$0xff]   ;;  %v3805_v53 = vld [vmem:[#allocation9 + $0x100] sm:$0xff]  }
 0x255   : > { %1367 = vst [vmem:[#allocation3 + $0x98] sm:$0xff] %v4534_v7  ;;  %3388 = vmatprep.mubr.bf16.mxu1 %v1661_v8  ;;  %v4555_v14 = vpack.c.bf16 %v4537_v9, %v4546_v12  ;;  %3344 = vmatprep.mubr.bf16.mxu0 %v4541_v10  ;;  %v4560_v16 = vpack.c.bf16 %v4524_v49, %v4534_v7  ;;  %v1804_v26 = vld [vmem:[#allocation3 + $0x37] sm:$0xff]  ;;  %v1373_v57 = vld [vmem:[#allocation3 + $0x4f] sm:$0xff]  ;;  %v1806_v4 = vld [vmem:[#allocation3 + $0x67] sm:$0xff]  ;;  %v2722_v8 = vsel %vm444_vm1, %v2708_v0, 0 }
 0x256   : > { %3352 = vmatprep.subr.bf16.mxu0 %v3793_v6  ;;  %v1963_v18 = vpack.c.bf16 %v4534_v7, %v4526_v3  ;;  %v2111_v19 = vpack.c.bf16 %v4546_v12, %v4531_v5  ;;  %v1811_v34 = vpack.c.bf16 %v1804_v26, %v1371_v58  ;;  %v3804_v56 = vld [vmem:[#allocation9 + $0xf8] sm:$0xff]   ;;  %v4590_v61 = vpack.c.bf16 %v1373_v57, %v1804_v26  ;;  %v3807_v26 = vld [vmem:[#allocation9 + $0x110] sm:$0xff]   ;;  %v3826_v49 = vld [vmem:[#allocation9 + $0x1a8] sm:$0xff]  }
 0x257   : > { %3389 = vmatmul.mubr.bf16.vlgmr.msra.gmra.mrb[0].mxu1 %v4555_v14  ;;  %3345 = vmatmul.mubr.bf16.gmra.mrb[12].mxu0 %v4560_v16  ;;  %v3827_v3 = vld [vmem:[#allocation9 + $0x1b0] sm:$0xff]   ;;  %v3828_v5 = vld [vmem:[#allocation9 + $0x1b8] sm:$0xff]   ;;  %v3829_v7 = vld [vmem:[#allocation9 + $0x1c0] sm:$0xff]  }
 0x258   : > { %3397 = vmatpush3.bf16.msra.mxu1 %v4495_v23  ;;  %3353 = vmatpush3.bf16.msra.mxu0 %v3793_v6  ;;  %v3830_v9 = vld [vmem:[#allocation9 + $0x1c8] sm:$0xff]   ;;  %v2261_v12 = vld [vmem:[#allocation3 + $0xdf] sm:$0xff] }
 0x259   : > { %3398 = vmatprep.subr.bf16.mxu1 %v3792_v15  ;;  %3364 = vmatprep.mubr.bf16.mxu0 %v1378_v20  ;;  %v4577_v28 = vld [vmem:[#allocation3 + $0xb1] sm:$0xff] }
 0x25a   : > { %v4569_v22 = vld [vmem:[#allocation3 + $0x81] sm:$0xff]  ;;  %3354 = vmatprep.subr.bf16.mxu0 %v3795_v17 }
 0x25b   : > { %v4573_v25 = vpack.c.bf16 %v4569_v22, %v4543_v11  ;;  %v1375_v2 = vld [vmem:[#allocation3 + $0x7f] sm:$0xff]  ;;  %v4641_v45 = vld [vmem:[#allocation3 + $0xc9] sm:$0xff]  ;;  %v3831_v11 = vld [vmem:[#allocation9 + $0x1d0] sm:$0xff]  }
 0x25c   : > { %3399 = vmatpush3.bf16.msra.mxu1 %v3792_v15  ;;  %v4575_v27 = vld [vmem:[#allocation3 + $0x99] sm:$0xff]  ;;  %3355 = vmatpush3.bf16.msra.mxu0 %v3795_v17  ;;  %v4593_v6 = vpack.c.bf16 %v1375_v2, %v1806_v4  ;;  %v1812_v15 = vpack.c.bf16 %v1806_v4, %v1373_v57  ;;  %v3806_v17 = vld [vmem:[#allocation9 + $0x108] sm:$0xff]   ;;  %v2114_v46 = vpack.c.bf16 %v4641_v45, %v4577_v28 }
 0x25d   : > { %3392 = vmatprep.mubr.bf16.mxu1 %v4573_v25  ;;  %3400 = vmatprep.subr.bf16.mxu1 %v3794_v21  ;;  %v4582_v23 = vpack.c.bf16 %v4577_v28, %v4575_v27  ;;  %v2113_v41 = vpack.c.bf16 %v4575_v27, %v4569_v22  ;;  %v1808_v58 = vld [vmem:[#allocation3 + $0x97] sm:$0xff]  ;;  %v3837_v28 = vld [vmem:[#allocation9 + $0x200] sm:$0xff]  }
 0x25e   : > { %3356 = vmatprep.subr.bf16.mxu0 %v3797_v24  ;;  %v1813_v20 = vpack.c.bf16 %v1808_v58, %v1375_v2  ;;  %v3835_v22 = vld [vmem:[#allocation9 + $0x1f0] sm:$0xff]   ;;  %v3836_v27 = vld [vmem:[#allocation9 + $0x1f8] sm:$0xff]  }
 0x25f   : > { %3393 = vmatmul.mubr.bf16.gmra.mrb[4].mxu1 %v4582_v23 }
 0x260   : > { %3401 = vmatpush3.bf16.msra.mxu1 %v3794_v21  ;;  %3412 = vmatprep.mubr.bf16.mxu1 %v1811_v34  ;;  %v1377_v21 = vld [vmem:[#allocation3 + $0xaf] sm:$0xff] }
 0x261   : > { %3402 = vmatprep.subr.bf16.mxu1 %v3796_v30  ;;  %3357 = vmatpush3.bf16.msra.mxu0 %v3797_v24  ;;  %v4598_v24 = vpack.c.bf16 %v1377_v21, %v1808_v58 }
 0x262   : > { %3358 = vmatprep.subr.bf16.mxu0 %v3799_v38 }
 0x264   : > { %3403 = vmatpush3.bf16.msra.mxu1 %v3796_v30  ;;  %v4601_v30 = vld [vmem:[#allocation3 + $0xc7] sm:$0xff] }
 0x265   : > { %3404 = vmatprep.subr.bf16.mxu1 %v3798_v48  ;;  %3359 = vmatpush3.bf16.msra.mxu0 %v3799_v38  ;;  %v1814_v34 = vpack.c.bf16 %v4601_v30, %v1377_v21  ;;  %v3808_v38 = vld [vmem:[#allocation9 + $0x118] sm:$0xff]  }
 0x266   : > { %3360 = vmatprep.subr.bf16.mxu0 %v3801_v55 }
 0x268   : > { %3405 = vmatpush3.bf16.msra.mxu1 %v3798_v48  ;;  %v3809_v48 = vld [vmem:[#allocation9 + $0x120] sm:$0xff]  }
 0x269   : > { %3406 = vmatprep.subr.bf16.mxu1 %v3800_v60  ;;  %3361 = vmatpush3.bf16.msra.mxu0 %v3801_v55  ;;  %v3845_v55 = vld [vmem:[#allocation3] sm:$0xff] }
 0x26a   : > { %3362 = vmatprep.subr.bf16.mxu0 %v3803_v43 }
 0x26c   : > { %3407 = vmatpush3.bf16.msra.mxu1 %v3800_v60  ;;  %v2415_v60 = vpack.c.bf16 %v3845_v55, %v4529_v62  ;;  %v2561_v62 = vld [vmem:[#allocation3 + $0xe1] sm:$0xff] }
 0x26d   : > { %3408 = vmatprep.subr.bf16.mxu1 %v3802_v51  ;;  %3363 = vmatpush3.bf16.msra.mxu0 %v3803_v43  ;;  %v3840_v43 = vld [vmem:[#allocation9 + $0x218] sm:$0xff]  }
 0x26e   : > { %3695 = vmatprep.subr.msk.bf16.mxu0 %vm444_vm1, %v2708_v0  ;;  %v3844_v0 = vld [vmem:[#allocation9 + $0x238] sm:$0xff]  }
 0x270   : > { %3409 = vmatpush3.bf16.msra.mxu1 %v3802_v51  ;;  %3365 = vmatmul.mubr.bf16.vlgmr.msra.gmra.mrb[8].mxu0 %v4590_v61  ;;  %v3841_v51 = vld [vmem:[#allocation9 + $0x220] sm:$0xff]  }
 0x271   : > { %3410 = vmatprep.subr.bf16.mxu1 %v3804_v56  ;;  %3368 = vmatprep.mubr.bf16.mxu0 %v4593_v6 }
 0x272   : > { %3541 = vmatpush3.bf16.msra.mxu0 %v2722_v8 }
 0x274   : > { %3411 = vmatpush3.bf16.msra.mxu1 %v3804_v56 }
 0x275   : > { %3420 = vmatprep.subr.bf16.mxu1 %v3805_v53 }
 0x277   : > { %3413 = vmatmul.mubr.bf16.vlgmr.msra.gmra.mrb[0].mxu1 %v1812_v15 }
 0x278   : > { %3416 = vmatprep.mubr.bf16.mxu1 %v1813_v20  ;;  %3421 = vmatpush3.bf16.msra.mxu1 %v3805_v53 }
 0x279   : > { %3422 = vmatprep.subr.bf16.mxu1 %v3806_v17  ;;  %3369 = vmatmul.mubr.bf16.gmra.mrb[12].mxu0 %v4598_v24 }
 0x27a   : > { %3542 = vmatprep.mubr.msk.bf16.mxu0 %vm365_vm0, %v2704_v37  ;;  %v3815_v37 = vld [vmem:[#allocation9 + $0x150] sm:$0xff]  }
 0x27c   : > { %3423 = vmatpush3.bf16.msra.mxu1 %v3806_v17 }
 0x27d   : > { %3424 = vmatprep.subr.bf16.mxu1 %v3807_v26 }
 0x27f   : > { %3417 = vmatmul.mubr.bf16.gmra.mrb[4].mxu1 %v1814_v34 }
 0x280   : > { %3425 = vmatpush3.bf16.msra.mxu1 %v3807_v26  ;;  %3436 = vmatprep.mubr.bf16.mxu1 %v1961_v1  ;;  %v3825_v1 = vld [vmem:[#allocation9 + $0x1a0] sm:$0xff]  }
 0x281   : > { %3426 = vmatprep.subr.bf16.mxu1 %v3808_v38  ;;  %3543 = vmatmul.mubr.msk.bf16.vlgmr.msra.gmra.mrb[16].mxu0 %vm365_vm0, %v2705_v36  ;;  %v3814_v36 = vld [vmem:[#allocation9 + $0x148] sm:$0xff]  }
 0x282   : > { %3546 = vmatprep.mubr.msk.bf16.mxu0 %vm365_vm0, %v2706_v44  ;;  %v3818_v44 = vld [vmem:[#allocation9 + $0x168] sm:$0xff]  }
 0x284   : > { %3427 = vmatpush3.bf16.msra.mxu1 %v3808_v38  ;;  %v3068_v38 = vld [vmem:[%s4727_s5] ss:$0 sm:$0xff] }
 0x285   : > { %3428 = vmatprep.subr.bf16.mxu1 %v3809_v48 }
 0x288   : > { %3429 = vmatpush3.bf16.msra.mxu1 %v3809_v48 }
 0x289   : > { %3430 = vmatprep.subr.bf16.mxu1 %v3810_v31  ;;  %3547 = vmatmul.mubr.msk.bf16.gmra.mrb[20].mxu0 %vm365_vm0, %v2707_v52  ;;  %v3821_v52 = vld [vmem:[#allocation9 + $0x180] sm:$0xff]  }
 0x28c   : > { %3431 = vmatpush3.bf16.msra.mxu1 %v3810_v31 }
 0x28d   : > { %3432 = vmatprep.subr.bf16.mxu1 %v3811_v35 }
 0x290   : > { %3433 = vmatpush3.bf16.msra.mxu1 %v3811_v35 }
 0x291   : > { %3434 = vmatprep.subr.bf16.mxu1 %v3812_v29 }
 0x294   : > { %3435 = vmatpush3.bf16.msra.mxu1 %v3812_v29 }
 0x295   : > { %3444 = vmatprep.subr.bf16.mxu1 %v3813_v33 }
 0x297   : > { %3437 = vmatmul.mubr.bf16.vlgmr.msra.gmra.mrb[0].mxu1 %v1962_v54  ;;  %v3824_v54 = vld [vmem:[#allocation9 + $0x198] sm:$0xff]  }
 0x298   : > { %3440 = vmatprep.mubr.bf16.mxu1 %v1963_v18  ;;  %3445 = vmatpush3.bf16.msra.mxu1 %v3813_v33  ;;  %v3833_v18 = vld [vmem:[#allocation9 + $0x1e0] sm:$0xff]  }
 0x299   : > { %3446 = vmatprep.subr.bf16.mxu1 %v3814_v36 }
 0x29c   : > { %3447 = vmatpush3.bf16.msra.mxu1 %v3814_v36 }
 0x29d   : > { %3448 = vmatprep.subr.bf16.mxu1 %v3815_v37 }
 0x29f   : > { %3441 = vmatmul.mubr.bf16.gmra.mrb[4].mxu1 %v1964_v63  ;;  %v2265_v63 = vpack.c.bf16 %v2261_v12, %v4601_v30 }
 0x2a0   : > { %3449 = vmatpush3.bf16.msra.mxu1 %v3815_v37  ;;  %3460 = vmatprep.mubr.bf16.mxu1 %v2111_v19  ;;  %v3834_v19 = vld [vmem:[#allocation9 + $0x1e8] sm:$0xff]  }
 0x2a1   : > { %3450 = vmatprep.subr.bf16.mxu1 %v3816_v39 }
 0x2a4   : > { %3451 = vmatpush3.bf16.msra.mxu1 %v3816_v39 }
 0x2a5   : > { %3452 = vmatprep.subr.bf16.mxu1 %v3817_v42 }
 0x2a8   : > { %3453 = vmatpush3.bf16.msra.mxu1 %v3817_v42 }
 0x2a9   : > { %3454 = vmatprep.subr.bf16.mxu1 %v3818_v44 }
 0x2ac   : > { %3455 = vmatpush3.bf16.msra.mxu1 %v3818_v44 }
 0x2ad   : > { %3456 = vmatprep.subr.bf16.mxu1 %v3819_v47 }
 0x2b0   : > { %3457 = vmatpush3.bf16.msra.mxu1 %v3819_v47 }
 0x2b1   : > { %3458 = vmatprep.subr.bf16.mxu1 %v3820_v50 }
 0x2b4   : > { %3459 = vmatpush3.bf16.msra.mxu1 %v3820_v50 }
 0x2b5   : > { %3468 = vmatprep.subr.bf16.mxu1 %v3821_v52 }
 0x2b7   : > { %3461 = vmatmul.mubr.bf16.vlgmr.msra.gmra.mrb[0].mxu1 %v2112_v13  ;;  %v3832_v13 = vld [vmem:[#allocation9 + $0x1d8] sm:$0xff]  }
 0x2b8   : > { %3464 = vmatprep.mubr.bf16.mxu1 %v2113_v41  ;;  %3469 = vmatpush3.bf16.msra.mxu1 %v3821_v52  ;;  %v3838_v41 = vld [vmem:[#allocation9 + $0x208] sm:$0xff]  }
 0x2b9   : > { %3470 = vmatprep.subr.bf16.mxu1 %v3822_v32 }
 0x2bc   : > { %3471 = vmatpush3.bf16.msra.mxu1 %v3822_v32 }
 0x2bd   : > { %3472 = vmatprep.subr.bf16.mxu1 %v3823_v40 }
 0x2bf   : > { %3465 = vmatmul.mubr.bf16.gmra.mrb[4].mxu1 %v2114_v46 }
 0x2c0   : > { %3473 = vmatpush3.bf16.msra.mxu1 %v3823_v40  ;;  %3484 = vmatprep.mubr.bf16.mxu1 %v4590_v61 }
 0x2c1   : > { %3474 = vmatprep.subr.bf16.mxu1 %v3824_v54 }
 0x2c4   : > { %3475 = vmatpush3.bf16.msra.mxu1 %v3824_v54 }
 0x2c5   : > { %3476 = vmatprep.subr.bf16.mxu1 %v3825_v1 }
 0x2c8   : > { %3477 = vmatpush3.bf16.msra.mxu1 %v3825_v1 }
 0x2c9   : > { %3478 = vmatprep.subr.bf16.mxu1 %v3826_v49 }
 0x2cc   : > { %3479 = vmatpush3.bf16.msra.mxu1 %v3826_v49 }
 0x2cd   : > { %3480 = vmatprep.subr.bf16.mxu1 %v3827_v3 }
 0x2d0   : > { %3481 = vmatpush3.bf16.msra.mxu1 %v3827_v3 }
 0x2d1   : > { %3482 = vmatprep.subr.bf16.mxu1 %v3828_v5 }
 0x2d4   : > { %3483 = vmatpush3.bf16.msra.mxu1 %v3828_v5 }
 0x2d5   : > { %3492 = vmatprep.subr.bf16.mxu1 %v3829_v7 }
 0x2d7   : > { %3485 = vmatmul.mubr.bf16.vlgmr.msra.gmra.mrb[0].mxu1 %v4593_v6 }
 0x2d8   : > { %3488 = vmatprep.mubr.bf16.mxu1 %v4598_v24  ;;  %3493 = vmatpush3.bf16.msra.mxu1 %v3829_v7 }
 0x2d9   : > { %3494 = vmatprep.subr.bf16.mxu1 %v3830_v9 }
 0x2dc   : > { %3495 = vmatpush3.bf16.msra.mxu1 %v3830_v9 }
 0x2dd   : > { %3496 = vmatprep.subr.bf16.mxu1 %v3831_v11 }
 0x2df   : > { %3489 = vmatmul.mubr.bf16.gmra.mrb[4].mxu1 %v2265_v63 }
 0x2e0   : > { %3497 = vmatpush3.bf16.msra.mxu1 %v3831_v11  ;;  %3508 = vmatprep.mubr.bf16.mxu1 %v4519_v59  ;;  %v3839_v59 = vld [vmem:[#allocation9 + $0x210] sm:$0xff]  }
 0x2e1   : > { %3498 = vmatprep.subr.bf16.mxu1 %v3832_v13 }
 0x2e4   : > { %3499 = vmatpush3.bf16.msra.mxu1 %v3832_v13 }
 0x2e5   : > { %3500 = vmatprep.subr.bf16.mxu1 %v3833_v18 }
 0x2e8   : > { %3501 = vmatpush3.bf16.msra.mxu1 %v3833_v18 }
 0x2e9   : > { %3502 = vmatprep.subr.bf16.mxu1 %v3834_v19 }
 0x2ec   : > { %3503 = vmatpush3.bf16.msra.mxu1 %v3834_v19 }
 0x2ed   : > { %3504 = vmatprep.subr.bf16.mxu1 %v3835_v22 }
 0x2f0   : > { %3505 = vmatpush3.bf16.msra.mxu1 %v3835_v22 }
 0x2f1   : > { %3506 = vmatprep.subr.bf16.mxu1 %v3836_v27 }
 0x2f4   : > { %3507 = vmatpush3.bf16.msra.mxu1 %v3836_v27 }
 0x2f5   : > { %3516 = vmatprep.subr.bf16.mxu1 %v3837_v28 }
 0x2f7   : > { %3509 = vmatmul.mubr.bf16.vlgmr.msra.gmra.mrb[0].mxu1 %v4541_v10  ;;  %v3842_v10 = vld [vmem:[#allocation9 + $0x228] sm:$0xff]  }
 0x2f8   : > { %3512 = vmatprep.mubr.bf16.mxu1 %v4560_v16  ;;  %3517 = vmatpush3.bf16.msra.mxu1 %v3837_v28  ;;  %v3843_v16 = vld [vmem:[#allocation9 + $0x230] sm:$0xff]  }
 0x2f9   : > { %3518 = vmatprep.subr.bf16.mxu1 %v3838_v41 }
 0x2fc   : > { %3519 = vmatpush3.bf16.msra.mxu1 %v3838_v41 }
 0x2fd   : > { %3520 = vmatprep.subr.bf16.mxu1 %v3839_v59 }
 0x2ff   : > { %3513 = vmatmul.mubr.bf16.gmra.mrb[4].mxu1 %v2415_v60 }
 0x300   : > { %3521 = vmatpush3.bf16.msra.mxu1 %v3839_v59  ;;  %3532 = vmatprep.mubr.bf16.mxu1 %v4555_v14  ;;  %v2565_v14 = vpack.c.bf16 %v2561_v62, %v4641_v45 }
 0x301   : > { %3522 = vmatprep.subr.bf16.mxu1 %v3840_v43 }
 0x304   : > { %3523 = vmatpush3.bf16.msra.mxu1 %v3840_v43 }
 0x305   : > { %3524 = vmatprep.subr.bf16.mxu1 %v3841_v51 }
 0x308   : > { %3525 = vmatpush3.bf16.msra.mxu1 %v3841_v51 }
 0x309   : > { %3526 = vmatprep.subr.bf16.mxu1 %v3842_v10 }
 0x30c   : > { %3527 = vmatpush3.bf16.msra.mxu1 %v3842_v10 }
 0x30d   : > { %3528 = vmatprep.subr.bf16.mxu1 %v3843_v16 }
 0x310   : > { %3529 = vmatpush3.bf16.msra.mxu1 %v3843_v16 }
 0x311   : > { %3530 = vmatprep.subr.bf16.mxu1 %v3844_v0 }
 0x314   : > { %3531 = vmatpush3.bf16.msra.mxu1 %v3844_v0 }
 0x317   : > { %3533 = vmatmul.mubr.bf16.vlgmr.msra.gmra.mrb[0].mxu1 %v4573_v25 }
 0x318   : > { %3536 = vmatprep.mubr.bf16.mxu1 %v4582_v23 }
 0x31f   : > { %3537 = vmatmul.mubr.bf16.gmra.mrb[4].mxu1 %v2565_v14 }
 0x343   : > { %v3366_v2 = vpop.f32.mrb[8].mxu0 }
 0x344   : > { %v1622_v56 = vpop.f32.mrb[9].mxu0 }
 0x345   : > { %v3367_v57 = vpop.f32.mrb[10].mxu0 }
 0x346   : > { %v1625_v61 = vpop.f32.mrb[11].mxu0 }
 0x34c   : > { %v3370_v4 = vpop.f32.mrb[12].mxu0 }
 0x34d   : > { %v1638_v6 = vpop.f32.mrb[13].mxu0 }
 0x34e   : > { %v3371_v8 = vpop.f32.mrb[14].mxu0 }
 0x34f   : > { %v1641_v53 = vpop.f32.mrb[15].mxu0 }
 0x354   : > { %v3544_v58 = vpop.f32.mrb[16].mxu0 }
 0x355   : > { %v2758_v15 = vpop.f32.mrb[17].mxu0 }
 0x356   : > { %v3545_v17 = vpop.f32.mrb[18].mxu0 }
 0x357   : > { %v2761_v20 = vpop.f32.mrb[19].mxu0 }
 0x35c   : > { %v3548_v25 = vpop.f32.mrb[20].mxu0 }
 0x35d   : > { %v2774_v21 = vpop.f32.mrb[21].mxu0 }
 0x35e   : > { %v3549_v23 = vpop.f32.mrb[22].mxu0 }
 0x35f   : > { %v2777_v24 = vpop.f32.mrb[23].mxu0 }
 0x3ea   : > { %v3534_v26 = vpop.f32.mrb[0].mxu1 }
 0x3eb   : > { %v3550_v30 = vadd.f32 %v3534_v26, %v3366_v2  ;;  %v2665_v34 = vpop.f32.mrb[1].mxu1 }
 0x3ec   : > { %v3552_v48 = vadd.f32 %v2665_v34, %v1622_v56  ;;  %v3535_v31 = vpop.f32.mrb[2].mxu1 }
 0x3ed   : > { %v3551_v35 = vadd.f32 %v3550_v30, %v3544_v58  ;;  %v3554_v29 = vadd.f32 %v3535_v31, %v3367_v57  ;;  %v2668_v33 = vpop.f32.mrb[3].mxu1 }
 0x3ee   : > { %v3553_v36 = vadd.f32 %v3552_v48, %v2758_v15  ;;  %v3556_v37 = vadd.f32 %v2668_v33, %v1625_v61 }
 0x3ef   : > { %v2806_v39 = vadd.f32 %v3551_v35, %v3068_v38  ;;  %v3555_v42 = vadd.f32 %v3554_v29, %v3545_v17 }
 0x3f0   : > { %v2804_v44 = vadd.f32 %v3553_v36, %v3068_v38  ;;  %v3557_v47 = vadd.f32 %v3556_v37, %v2761_v20 }
 0x3f1   : > { %v2814_v50 = vmax.f32 %v2806_v39, 0.0  ;;  %v2807_v52 = vadd.f32 %v3555_v42, %v3068_v38 }
 0x3f2   : > { %v2812_v32 = vmax.f32 %v2804_v44, 0.0  ;;  %v2805_v40 = vadd.f32 %v3557_v47, %v3068_v38  ;;  %v3538_v45 = vpop.f32.mrb[4].mxu1 }
 0x3f3   : > { %2822 = vst [vmem:[%s4661_s30 + $0x10] sm:$0xff] %v2814_v50  ;;  %v2815_v46 = vmax.f32 %v2807_v52, 0.0  ;;  %v3558_v54 = vadd.f32 %v3538_v45, %v3370_v4  ;;  %v2681_v1 = vpop.f32.mrb[5].mxu1 }
 0x3f4   : > { %2820 = vst [vmem:[%s4661_s30] sm:$0xff] %v2812_v32  ;;  %v2813_v49 = vmax.f32 %v2805_v40, 0.0  ;;  %v3560_v3 = vadd.f32 %v2681_v1, %v1638_v6  ;;  %v3539_v5 = vpop.f32.mrb[6].mxu1 }
 0x3f5   : > { %2823 = vst [vmem:[%s4661_s30 + $0x18] sm:$0xff] %v2815_v46  ;;  %v3559_v7 = vadd.f32 %v3558_v54, %v3548_v25  ;;  %v3562_v9 = vadd.f32 %v3539_v5, %v3371_v8  ;;  %v2684_v11 = vpop.f32.mrb[7].mxu1 }
 0x3f6   : > { %2821 = vst [vmem:[%s4661_s30 + $0x8] sm:$0xff] %v2813_v49  ;;  %v3561_v12 = vadd.f32 %v3560_v3, %v2774_v21  ;;  %v3564_v63 = vadd.f32 %v2684_v11, %v1641_v53 }
 0x3f7   : > { %v2810_v13 = vadd.f32 %v3559_v7, %v3068_v38  ;;  %v3563_v18 = vadd.f32 %v3562_v9, %v3549_v23 }
 0x3f8   : > { %v2808_v19 = vadd.f32 %v3561_v12, %v3068_v38  ;;  %v3565_v22 = vadd.f32 %v3564_v63, %v2777_v24 }
 0x3f9   : > { %v2818_v27 = vmax.f32 %v2810_v13, 0.0  ;;  %v2811_v28 = vadd.f32 %v3563_v18, %v3068_v38 }
 0x3fa   : > { %v2816_v41 = vmax.f32 %v2808_v19, 0.0  ;;  %v2809_v59 = vadd.f32 %v3565_v22, %v3068_v38 }
 0x3fb   : > { %2826 = vst [vmem:[%s4661_s30 + $0x30] sm:$0xff] %v2818_v27  ;;  %v2819_v55 = vmax.f32 %v2811_v28, 0.0 }
 0x3fc   : > { %2824 = vst [vmem:[%s4661_s30 + $0x20] sm:$0xff] %v2816_v41  ;;  %v2817_v60 = vmax.f32 %v2809_v59, 0.0 }
 0x3fd   : > { %2827 = vst [vmem:[%s4661_s30 + $0x38] sm:$0xff] %v2819_v55 }
 0x3fe   : > { %2825 = vst [vmem:[%s4661_s30 + $0x28] sm:$0xff] %v2817_v60 }
 0x3ff   : > { %3945 = shalt.err (!%p3942_p2)
}
 0x400   : > { %s3946_s18 = scalar_lea.hbm %s4673_s8, 1024  ;;  %s3950_s7 = scalar_lea.hbm %s4728_s6, 2048 }
 0x401   : > { %p3947_p13 = scmp.ne.s32.totalorder %s4673_s8, %s3946_s18  ;;  %p3951_p4 = scmp.lt.u32.totalorder %s4673_s8, %s4728_s6 }
 0x402   : > { %p3952_p7 = scmp.lt.u32.totalorder %s3950_s7, %s3946_s18  ;;  %p3954_p11 = scmp.lt.u32.totalorder %s3946_s18, %s4673_s8 }
 0x403   : > { %p3948_p6 = pnand %p3947_p13, %p4742_p0 }
 0x404   : > { %p3953_p8 = por %p3952_p7, %p3951_p4 }
 0x405   : > { %p3949_p10 = pneg %p3948_p6 }
 0x406   : > { %p3955_p1 = por %p3954_p11, %p3953_p8 }
 0x408   : > { %p3956_p3 = pnand %p3955_p1, %p3949_p10 }
 0x40a   : > { %3959 = shalt.err (!%p3956_p3)
}
 0x40b   : > { %s4016_s10 = smov 128   ;;  %s4017_s14 = smov 8  }
 0x40c   : > { %3706 = dma.vmem_to_hbm [thread:$0]  (%p4742_p0), %s4675_s9, 1024, %s4673_s8, %s2829_s25, %s4016_s10, %s4016_s10, %s4017_s14  }
 0x40d PF: > { %s2857_s27 = sand.u32 1, %s3990_s21   ;;  %p4743_p5 = scmp.ne.s32.totalorder %s4733_s28, 0 }
 0x40e   : > { %p4744_p9 = scmp.ge.s32.totalorder %s4002_s24, 2  ;;  %s2858_s29 = scalar_lea.sflag [#allocation6], %s2857_s27 }
 0x410   : > { %p3720_p12 = pnand %p4744_p9, %p4743_p5 }
 0x412   : > { %3985 = dma.done.wait (!%p3720_p12), %s2858_s29, 1024  }
 0x413   : > { %3987 = vsyncadd (!%p3720_p12), %s2858_s29, 4294966272  ;;  %p20_p2 = scmp.ge.s32.totalorder %s4163_s26, 4   ;;  %s4745_s21 = smov %s3994_s22 }
 0x414   : > { %s4746_s22 = smov %s3998_s23  ;;  %s4747_s23 = smov %s4172_s11 }
 0x415   : > { %s4748_s24 = smov %s4163_s26  ;;  %22 = sbr.rel (!%p20_p2) target bundleno = 6 (0x6), region = 118 }
 0x41c   :  { %2863 = vsyncpa [#allocation5], 1 }
 0x41d   :  { %2865 = vsyncpa [#allocation5 + $0x1], 1 }
 0x41e   :  { %2866 = vsyncpa [#allocation8], 1 }
 0x41f   :  { %2867 = vsyncpa [#allocation6], 1 }
 0x420   :  { %2869 = vsyncpa [#allocation6 + $0x1], 1 }

</bundles_post_ra>
